<compile_context>
chip_gen: v7x
topology: tpu7x:2x2x1
jax: 0.10.0
libtpu: 0.0.40
codegen_flags: <defaults>
</compile_context>

<pallas_src>
import functools

import numpy as np
import jax
import jax.numpy as jnp
from jax import lax
from jax.experimental import pallas as pl
from jax.experimental.pallas import tpu as pltpu


def _round_up(x, m):
    return ((x + m - 1) // m) * m


# ----------------------------------------------------------------------------
# Kernel 1: encoder + inverse-dynamics + RND heads (row-tiled)
# ----------------------------------------------------------------------------
def _deir_rnd_kernel(x_ref, xn_ref,
                     wx_ref, bx_ref, encw_ref, encb_ref,
                     iw1a_ref, iw1b_ref, ib1_ref, iw2_ref, ib2_ref,
                     tw2_ref, tb2_ref, pw2_ref, pb2_ref,
                     tw3_ref, pw3_ref, db3_ref,
                     curr_emb_ref, next_emb_ref, misc_ref,
                     *, feat_pad, hidden, loss_lane, inv_rnd_feat):
    dot = functools.partial(jnp.dot, preferred_element_type=jnp.float32)
    bf16 = jnp.bfloat16
    x = x_ref[...].astype(bf16)
    xn = xn_ref[...].astype(bf16)

    # --- fused K=obs_dim push: encoder + RND layer-1 (target & predictor) ---
    # zx columns: [0:feat_pad] encoder, [feat_pad:feat_pad+hidden] RND target,
    # [feat_pad+hidden:] RND predictor.  All slice boundaries are 128-aligned.
    zx = dot(x, wx_ref[...]) + bx_ref[...]                      # [t, feat_pad+2H]
    obs_feat = zx[:, :feat_pad]
    h1_t = jnp.maximum(zx[:, feat_pad:feat_pad + hidden], 0.0)
    h1_p = jnp.maximum(zx[:, feat_pad + hidden:], 0.0)

    next_feat = dot(xn, encw_ref[...]) + encb_ref[...]          # [t, feat_pad]
    curr_emb_ref[...] = obs_feat
    next_emb_ref[...] = next_feat

    # --- inverse dynamics model (layer-1 weight pre-split on its input axis) -
    h = jnp.maximum(dot(obs_feat.astype(bf16), iw1a_ref[...])
                    + dot(next_feat.astype(bf16), iw1b_ref[...])
                    + ib1_ref[...], 0.0)
    pred = dot(h.astype(bf16), iw2_ref[...]) + ib2_ref[...]     # [t, misc_dim]

    # --- RND layers 2/3: only the target/predictor difference is needed ------
    h2_t = jnp.maximum(dot(h1_t.astype(bf16), tw2_ref[...]) + tb2_ref[...], 0.0)
    h2_p = jnp.maximum(dot(h1_p.astype(bf16), pw2_ref[...]) + pb2_ref[...], 0.0)
    diff = (dot(h2_p.astype(bf16), pw3_ref[...])
            - dot(h2_t.astype(bf16), tw3_ref[...]) + db3_ref[...])
    # padded columns contribute exactly 0 => sum * (1/rnd_feat) == mean over 288
    loss = jnp.sum(diff * diff, axis=-1, keepdims=True) * inv_rnd_feat

    # pack pred_act and the per-row loss into one lane-dense output block
    lane = lax.broadcasted_iota(jnp.int32, pred.shape, 1)
    misc_ref[...] = jnp.where(lane == loss_lane, loss, pred)


def _choose_row_tiling(n, tile_n):
    """Balanced row tiles: >=2 tiles when possible (v7x megacore), ragged tail
    spread across tiles instead of padding up to a full tile."""
    n8 = _round_up(max(n, 8), 8)
    num_tiles = max(1, -(-n8 // tile_n))
    if num_tiles == 1 and n8 >= 16:
        num_tiles = 2
    tile = _round_up(-(-n8 // num_tiles), 8)
    return tile, tile * num_tiles


@functools.partial(jax.jit, static_argnames=("rnd_feat", "tile_n"))
def _deir_rnd_call(x, xn, w, *, rnd_feat, tile_n):
    n, obs_dim = x.shape
    feat_pad = w["enc_w"].shape[1]
    hidden = w["tw2"].shape[0]
    misc_dim = w["inv_w2"].shape[1]
    rnd_feat_pad = w["tw3"].shape[1]

    tile, n_pad = _choose_row_tiling(n, tile_n)
    if n_pad != n:
        pad = ((0, n_pad - n), (0, 0))
        x = jnp.pad(x, pad)
        xn = jnp.pad(xn, pad)

    kernel = functools.partial(_deir_rnd_kernel, feat_pad=feat_pad,
                               hidden=hidden, loss_lane=misc_dim - 1,
                               inv_rnd_feat=1.0 / float(rnd_feat))

    weights = (w["wx"], w["bx"], w["enc_w"], w["enc_b"],
               w["inv_w1a"], w["inv_w1b"], w["inv_b1"], w["inv_w2"], w["inv_b2"],
               w["tw2"], w["tb2"], w["pw2"], w["pb2"],
               w["tw3"], w["pw3"], w["db3"])

    def row_spec(d):
        return pl.BlockSpec((tile, d), lambda i: (i, 0))

    in_specs = ([row_spec(obs_dim), row_spec(obs_dim)]
                + [pl.BlockSpec(wt.shape, lambda i: (0, 0)) for wt in weights])
    out_specs = (row_spec(feat_pad), row_spec(feat_pad), row_spec(misc_dim))
    out_shape = (jax.ShapeDtypeStruct((n_pad, feat_pad), jnp.float32),
                 jax.ShapeDtypeStruct((n_pad, feat_pad), jnp.float32),
                 jax.ShapeDtypeStruct((n_pad, misc_dim), jnp.float32))

    flops = 2 * n_pad * (obs_dim * (feat_pad + 2 * hidden)   # fused x push
                         + obs_dim * feat_pad                 # xn encoder
                         + 2 * feat_pad * hidden              # inverse layer 1
                         + hidden * misc_dim                  # inverse layer 2
                         + 2 * hidden * hidden                # RND layer 2 (t+p)
                         + 2 * hidden * rnd_feat_pad)         # RND layer 3 (t+p)
    bytes_accessed = (4 * 2 * n_pad * obs_dim
                      + sum(int(np.prod(v.shape)) * v.dtype.itemsize
                            for v in weights)
                      + 4 * n_pad * (2 * feat_pad + misc_dim))

    curr, nxt, misc = pl.pallas_call(
        kernel,
        grid=(n_pad // tile,),
        out_shape=out_shape,
        in_specs=in_specs,
        out_specs=out_specs,
        compiler_params=pltpu.CompilerParams(
            dimension_semantics=("parallel",),
            vmem_limit_bytes=32 * 1024 * 1024),
        cost_estimate=pl.CostEstimate(flops=flops, transcendentals=0,
                                      bytes_accessed=bytes_accessed),
    )(x, xn, *weights)
    return curr[:n], nxt[:n], misc[:n]


# ----------------------------------------------------------------------------
# Kernel 2: per-env squared distances among next-embeddings (dnext only)
# ----------------------------------------------------------------------------
def _pairdist_kernel(cand_ref, query_ref, dist_ref, *, e_blk, d):
    """dist[e, j, i] = ||next[j, e] - next_query[i, e]||^2 for e_blk envs."""
    dn = (((1,), (1,)), ((), ()))                       # contract feature axes
    ones = jnp.ones((1, d), jnp.float32)                # hoisted out of the loop
    for e in range(e_blk):                              # static unroll over envs
        c = cand_ref[:, e * d:(e + 1) * d]              # [S,  D] lane-aligned
        q = query_ref[:, e * d:(e + 1) * d]             # [TQ, D]
        cross = lax.dot_general(c, q, dn, preferred_element_type=jnp.float32)
        c_sq = jnp.sum(c * c, axis=-1, keepdims=True)   # [S, 1]
        q_sq_row = lax.dot_general(ones, q * q, dn,
                                   preferred_element_type=jnp.float32)  # [1, TQ]
        dist_ref[e] = jnp.maximum(c_sq + q_sq_row - 2.0 * cross, 0.0)


def _choose_env_block(batch, s, tq, d):
    """Envs per grid step: amortize per-step overhead for small S while keeping
    double-buffered blocks well under the 32 MiB scoped VMEM (and v7x's 64 MiB)."""
    per_env_bytes = 4 * (s * d + tq * d + s * tq)
    budget = 6 << 20
    e = max(1, min(batch, 16, budget // max(per_env_bytes, 1)))
    while batch % e:
        e -= 1
    return e


@functools.partial(jax.jit, static_argnames=("n_steps", "batch_size"))
def pairwise_next_sqdists(next_flat, *, n_steps, batch_size):
    """dnext[e, j, i] = ||next_emb[j, e] - next_emb[i, e]||^2 for all steps."""
    d = next_flat.shape[-1]                              # lane-dense (384)
    # free, contiguous reshape: [S*B, D] -> [S, B*D]; no XLA transpose needed
    nxt2d = next_flat.reshape(n_steps, batch_size * d)

    tq = n_steps                                         # query-axis tile
    if n_steps > 512:                                    # keep v7x VMEM bounded
        for cand in (512, 256, 128):
            if n_steps % cand == 0:
                tq = cand
                break
    e_blk = _choose_env_block(batch_size, n_steps, tq, d)
    kernel = functools.partial(_pairdist_kernel, e_blk=e_blk, d=d)

    return pl.pallas_call(
        kernel,
        grid=(batch_size // e_blk, n_steps // tq),
        out_shape=jax.ShapeDtypeStruct((batch_size, n_steps, n_steps),
                                       jnp.float32),
        in_specs=[pl.BlockSpec((n_steps, e_blk * d), lambda e, q: (0, e)),
                  pl.BlockSpec((tq, e_blk * d), lambda e, q: (q, e))],
        out_specs=pl.BlockSpec((e_blk, n_steps, tq), lambda e, q: (e, 0, q)),
        compiler_params=pltpu.CompilerParams(
            dimension_semantics=("parallel", "parallel"),
            vmem_limit_bytes=32 * 1024 * 1024),
    )(nxt2d, nxt2d)


# ----------------------------------------------------------------------------
# One-time weight preparation (fusion, zero-padding to lane-dense, bf16 cast)
# ----------------------------------------------------------------------------
def prepare_ngu_params(params):
    obs_dim, feat = params["enc_w"].shape
    hidden = params["tw2"].shape[0]
    rnd_feat = params["tw3"].shape[1]
    act = params["inv_w2"].shape[1]
    feat_pad = _round_up(feat, 128)
    rnd_feat_pad = _round_up(rnd_feat, 128)
    misc_dim = _round_up(act + 1, 128)     # pred_act lanes + one spare loss lane

    def padc(w, n):
        return jnp.pad(w, ((0, 0), (0, n - w.shape[1])))

    def padr(w, n):
        return jnp.pad(w, ((0, n - w.shape[0]), (0, 0)))

    bf16, f32 = jnp.bfloat16, jnp.float32
    enc_w_p = padc(params["enc_w"], feat_pad)
    enc_b_p = padc(params["enc_b"], feat_pad)

    weights = {
        # x path: encoder + RND layer-1 (target & predictor) fused on outputs
        "wx": jnp.concatenate([enc_w_p, params["tw1"], params["pw1"]],
                              axis=1).astype(bf16),
        "bx": jnp.concatenate([enc_b_p, params["tb1"], params["pb1"]],
                              axis=1).astype(f32),
        # xn path: encoder only
        "enc_w": enc_w_p.astype(bf16), "enc_b": enc_b_p.astype(f32),
        # inverse dynamics (layer-1 split on the input axis, rows zero-padded)
        "inv_w1a": padr(params["inv_w1a"], feat_pad).astype(bf16),
        "inv_w1b": padr(params["inv_w1b"], feat_pad).astype(bf16),
        "inv_b1": params["inv_b1"].astype(f32),
        "inv_w2": padc(params["inv_w2"], misc_dim).astype(bf16),
        "inv_b2": padc(params["inv_b2"], misc_dim).astype(f32),
        # RND layer 2
        "tw2": params["tw2"].astype(bf16), "tb2": params["tb2"].astype(f32),
        "pw2": params["pw2"].astype(bf16), "pb2": params["pb2"].astype(f32),
        # RND layer 3 (only predictor - target is needed; bias pre-differenced)
        "tw3": padc(params["tw3"], rnd_feat_pad).astype(bf16),
        "pw3": padc(params["pw3"], rnd_feat_pad).astype(bf16),
        "db3": (padc(params["pb3"], rnd_feat_pad)
                - padc(params["tb3"], rnd_feat_pad)).astype(f32),
    }
    weights = jax.device_put(weights)
    meta = dict(obs_dim=obs_dim, feat=feat, feat_pad=feat_pad, hidden=hidden,
                rnd_feat=rnd_feat, rnd_feat_pad=rnd_feat_pad,
                act=act, misc_dim=misc_dim)
    return weights, meta


# ----------------------------------------------------------------------------
# Host-side stateful glue (mirrors the reference numpy logic exactly)
# ----------------------------------------------------------------------------
class RunningMeanStd:
    def __init__(self, epsilon=1e-4, momentum=None, shape=()):
        self.mean = np.zeros(shape, "float64")
        self.var = np.ones(shape, "float64")
        self.count = epsilon
        self.eps = epsilon
        self.momentum = momentum
        self.std = np.sqrt(self.var)

    @staticmethod
    def update_ema(old_data, new_data, momentum):
        if old_data is None:
            return new_data
        return old_data * momentum + new_data * (1.0 - momentum)

    def update(self, x):
        batch_mean, batch_std, batch_count = (np.mean(x, axis=0),
                                              np.std(x, axis=0), x.shape[0])
        batch_var = np.square(batch_std)
        if self.momentum is None or self.momentum < 0:
            self.update_from_moments(batch_mean, batch_var, batch_count)
        else:
            self.mean = self.update_ema(self.mean, batch_mean, self.momentum)
            new_var = np.mean(np.square(x - self.mean))
            self.var = self.update_ema(self.var, new_var, self.momentum)
            self.std = np.sqrt(self.var)

    def update_from_moments(self, batch_mean, batch_var, batch_count):
        delta = batch_mean - self.mean
        tot_count = self.count + batch_count
        new_mean = self.mean + delta * batch_count / tot_count
        m_a = self.var * self.count
        m_b = batch_var * batch_count
        m2 = m_a + m_b + np.square(delta) * self.count * batch_count / tot_count
        new_var = m2 / tot_count
        self.mean = new_mean
        self.var = new_var
        self.std = np.sqrt(new_var)
        self.count = batch_count + self.count


def normalize_rewards(norm_type, rewards, mean, std, eps=1e-05):
    if norm_type <= 0:
        return rewards
    if norm_type == 1:
        return (rewards - mean) / (std + eps)
    if norm_type == 2:
        min_int_rew = np.min(rewards)
        max_int_rew = np.max(rewards)
        mean_int_rew = (max_int_rew + min_int_rew) / 2
        return (rewards - mean_int_rew) / (max_int_rew - min_int_rew + eps)
    if norm_type == 3:
        return rewards / (std + eps)
    raise NotImplementedError


# ----------------------------------------------------------------------------
# Parameter init (deterministic, synthetic)
# ----------------------------------------------------------------------------
def init_params(key, obs_dim, action_dim, feature_dim=288, hidden_dim=256,
                rnd_feature_dim=288, rnd_hidden_dim=256):
    keys = jax.random.split(key, 12)

    def lin(k, fan_in, fan_out):
        # stored as [in, out] (transposed vs torch nn.Linear)
        return (jax.random.normal(k, (fan_in, fan_out), jnp.float32)
                / np.sqrt(fan_in))

    def bias(dim):
        return jnp.zeros((1, dim), jnp.float32)

    inv_w1 = lin(keys[2], 2 * feature_dim, hidden_dim)
    params = {
        "enc_w": lin(keys[0], obs_dim, feature_dim),
        "enc_b": bias(feature_dim),
        "inv_w1a": inv_w1[:feature_dim, :],
        "inv_w1b": inv_w1[feature_dim:, :],
        "inv_b1": bias(hidden_dim),
        "inv_w2": lin(keys[3], hidden_dim, action_dim),
        "inv_b2": bias(action_dim),
        "tw1": lin(keys[4], obs_dim, rnd_hidden_dim), "tb1": bias(rnd_hidden_dim),
        "tw2": lin(keys[5], rnd_hidden_dim, rnd_hidden_dim), "tb2": bias(rnd_hidden_dim),
        "tw3": lin(keys[6], rnd_hidden_dim, rnd_feature_dim), "tb3": bias(rnd_feature_dim),
        "pw1": lin(keys[7], obs_dim, rnd_hidden_dim), "pb1": bias(rnd_hidden_dim),
        "pw2": lin(keys[8], rnd_hidden_dim, rnd_hidden_dim), "pb2": bias(rnd_hidden_dim),
        "pw3": lin(keys[9], rnd_hidden_dim, rnd_feature_dim), "pb3": bias(rnd_feature_dim),
    }
    return params


# ----------------------------------------------------------------------------
# NGU forward
# ----------------------------------------------------------------------------
def ngu_forward(prepared, obs, next_obs, actions, obs_history, dones,
                ngu_knn_k=10, ngu_use_rnd=True, rnd_err_norm=1,
                ngu_dst_momentum=0.997, rnd_err_momentum=-1, tile_n=512):
    weights, meta = prepared
    n_steps, batch_size, obs_dim = obs.shape
    action_dim = actions.shape[-1]
    feature_dim = meta["feat"]

    # ---- batched DEIR / RND compute on TPU (Pallas kernel 1) ----
    flat_obs = jnp.asarray(obs, jnp.float32).reshape(n_steps * batch_size, obs_dim)
    flat_next = jnp.asarray(next_obs, jnp.float32).reshape(n_steps * batch_size, obs_dim)
    curr_d, next_d, misc_d = _deir_rnd_call(flat_obs, flat_next, weights,
                                            rnd_feat=meta["rnd_feat"],
                                            tile_n=tile_n)

    # ---- every episodic distance to a next-embedding (Pallas kernel 2) ----
    dnext_d = pairwise_next_sqdists(next_d, n_steps=n_steps,
                                    batch_size=batch_size)
    jax.block_until_ready((curr_d, next_d, misc_d, dnext_d))

    # single device -> host readback; the remaining sequential/stateful
    # bookkeeping (EMA stats, top-k, history resets) runs on plain numpy.
    curr_pad = np.asarray(curr_d)                      # [n, feat_pad]
    next_pad = np.asarray(next_d)
    misc_np = np.asarray(misc_d)                       # [n, misc_dim]
    dnext_np = np.asarray(dnext_d)                     # [batch, S, S]
    dones_np = np.asarray(dones)

    curr_embs = curr_pad[:, :feature_dim].reshape(n_steps, batch_size, feature_dim)
    next_embs = next_pad[:, :feature_dim].reshape(n_steps, batch_size, feature_dim)
    pred_act_np = misc_np[:, :action_dim].reshape(n_steps, batch_size, action_dim)
    rnd_losses = misc_np[:, meta["misc_dim"] - 1].reshape(n_steps, batch_size)

    # (inv_loss is computed for fidelity with forward_deir but unused downstream)
    actions_np = np.asarray(actions)
    _inv_loss_per_step = np.mean((pred_act_np - actions_np) ** 2, axis=(1, 2))

    ngu_moving_avg_dists = RunningMeanStd(momentum=ngu_dst_momentum)
    rnd_err_running_stats = RunningMeanStd(momentum=rnd_err_momentum)

    # Histories carried in from the caller (rows predating this call) get a
    # tiny host-side fallback; anything produced within the call is served by
    # the precomputed device distance matrix (dnext) plus one host-computed
    # curr->next distance per reset.
    carry_init = [None if h is None else np.array(h, dtype=np.float32)
                  for h in obs_history]
    carry_active = [h is not None for h in obs_history]
    reset_step = [0] * batch_size

    reward_all = []
    for i in range(n_steps):
        for env_id in range(batch_size):
            if dones_np[i, env_id, 0]:
                obs_history[env_id] = None

        # lifelong (RND) rewards
        ngu_rnd_error = rnd_losses[i].copy()
        if rnd_err_norm > 0:
            rnd_err_running_stats.update(ngu_rnd_error)
            ngu_rnd_error = normalize_rewards(
                norm_type=rnd_err_norm, rewards=ngu_rnd_error,
                mean=rnd_err_running_stats.mean, std=rnd_err_running_stats.std)
        ngu_lifelong_rewards = ngu_rnd_error + 1

        int_rews = np.zeros(batch_size, dtype=np.float32)
        for env_id in range(batch_size):
            curr_emb = curr_embs[i, env_id].reshape(1, -1)
            next_emb = next_embs[i, env_id].reshape(1, -1)
            obs_embs = obs_history[env_id]
            if obs_embs is None:
                reset_step[env_id] = i
                carry_active[env_id] = False
                new_embs = [curr_emb, next_emb]
            else:
                new_embs = [obs_embs, next_emb]
            obs_embs = np.concatenate(new_embs, axis=0)
            obs_history[env_id] = obs_embs

            episodic_reward = 0.0
            if obs_embs.shape[0] > 1:
                # Gather ||hist_row - next_emb_i||^2 in history order from the
                # precomputed per-env dnext matrix; the single curr->next entry
                # after a reset is computed host-side (dcurr was dropped).
                if carry_active[env_id]:
                    diff = carry_init[env_id] - next_embs[i, env_id]
                    host_d = (diff * diff).sum(axis=-1).astype(np.float32)
                    d_vec = np.concatenate((host_d, dnext_np[env_id, :i, i]))
                else:
                    r = reset_step[env_id]
                    diff0 = curr_embs[r, env_id] - next_embs[i, env_id]
                    d0 = np.asarray([(diff0 * diff0).sum()], np.float32)
                    d_vec = np.concatenate((d0, dnext_np[env_id, r:i, i]))
                # match the reference cdist(...) ** 2 pipeline (sqrt, square)
                knn_dists = np.sqrt(np.maximum(d_vec, 0.0)).reshape(-1, 1) ** 2
                # NOTE: the reference sorts the (n_hist, 1) array along its
                # trailing size-1 axis (a no-op) then takes the first k rows;
                # replicated verbatim to keep the module's exact semantics.
                knn_dists = np.sort(knn_dists)[:ngu_knn_k]
                ngu_moving_avg_dists.update(knn_dists)
                moving_avg_dist = ngu_moving_avg_dists.mean
                normalized_dists = knn_dists / (moving_avg_dist + 1e-05)
                normalized_dists = np.maximum(normalized_dists - 0.008,
                                              np.zeros_like(knn_dists))
                kernel_values = 0.0001 / (normalized_dists + 0.0001)
                similarity = np.sqrt(kernel_values.sum()) + 0.001
                if similarity <= 8:
                    episodic_reward += 1 / similarity

            if ngu_use_rnd and ngu_lifelong_rewards is not None:
                L = 5.0
                lifelong_reward = min(max(ngu_lifelong_rewards[env_id], 1.0), L)
                int_rews[env_id] += episodic_reward * lifelong_reward
            else:
                int_rews[env_id] += episodic_reward
        reward_all.append(int_rews)

    reward_matrix = np.stack(reward_all)       # [n_steps, batch]
    reward_matrix = reward_matrix.T            # [batch, n_steps]
    reward_flattened = reward_matrix.flatten()
    reward_flattened = reward_flattened * 0.1
    return reward_flattened


# ----------------------------------------------------------------------------
# Main
# ----------------------------------------------------------------------------
if __name__ == "__main__":
    n_steps, batch, obs_dim, action_dim = 4, 4, 32, 8

    key = jax.random.PRNGKey(0)
    k_obs, k_next, k_act, k_par = jax.random.split(key, 4)

    obs = jax.random.normal(k_obs, (n_steps, batch, obs_dim), jnp.float32)
    next_obs = jax.random.normal(k_next, (n_steps, batch, obs_dim), jnp.float32)
    actions = jax.random.normal(k_act, (n_steps, batch, action_dim), jnp.float32)
    dones = np.zeros((n_steps, batch, 1), dtype=bool)
    dones[2, 1, 0] = True  # exercise the episodic-history reset path
    obs_history = [None] * batch

    params = init_params(k_par, obs_dim, action_dim)
    prepared = prepare_ngu_params(params)   # one-time fuse / pad / bf16 cast

    rewards = ngu_forward(prepared, obs, next_obs, actions, obs_history, dones)
    assert rewards.shape == (n_steps * batch,)
    assert np.all(np.isfinite(rewards))
    print("KERNEL_OK")
</pallas_src>

<mosaic_0001>
module attributes {stable_mosaic.version = 11 : i64} {
  func.func @_deir_rnd_kernel(%arg0: i32, %arg1: memref<8x32xf32, #tpu.memory_space<vmem>>, %arg2: memref<8x32xf32, #tpu.memory_space<vmem>>, %arg3: memref<32x896xbf16, #tpu.memory_space<vmem>>, %arg4: memref<1x896xf32, #tpu.memory_space<vmem>>, %arg5: memref<32x384xbf16, #tpu.memory_space<vmem>>, %arg6: memref<1x384xf32, #tpu.memory_space<vmem>>, %arg7: memref<384x256xbf16, #tpu.memory_space<vmem>>, %arg8: memref<384x256xbf16, #tpu.memory_space<vmem>>, %arg9: memref<1x256xf32, #tpu.memory_space<vmem>>, %arg10: memref<256x128xbf16, #tpu.memory_space<vmem>>, %arg11: memref<1x128xf32, #tpu.memory_space<vmem>>, %arg12: memref<256x256xbf16, #tpu.memory_space<vmem>>, %arg13: memref<1x256xf32, #tpu.memory_space<vmem>>, %arg14: memref<256x256xbf16, #tpu.memory_space<vmem>>, %arg15: memref<1x256xf32, #tpu.memory_space<vmem>>, %arg16: memref<256x384xbf16, #tpu.memory_space<vmem>>, %arg17: memref<256x384xbf16, #tpu.memory_space<vmem>>, %arg18: memref<1x384xf32, #tpu.memory_space<vmem>>, %arg19: memref<8x384xf32, #tpu.memory_space<vmem>>, %arg20: memref<8x384xf32, #tpu.memory_space<vmem>>, %arg21: memref<8x128xf32, #tpu.memory_space<vmem>>) attributes {dimension_semantics = [#tpu.dimension_semantics<parallel>], iteration_bounds = array<i64: 2>, scalar_prefetch = 0 : i64, scratch_operands = 0 : i64, tpu.core_type = #tpu.core_type<tc>, window_params = [{transform_indices = @transform_0, window_bounds = array<i64: 8, 32>}, {transform_indices = @transform_1, window_bounds = array<i64: 8, 32>}, {pipeline_mode = #tpu.pipeline_mode<synchronous>, transform_indices = @transform_2, window_bounds = array<i64: 32, 896>}, {pipeline_mode = #tpu.pipeline_mode<synchronous>, transform_indices = @transform_3, window_bounds = array<i64: 1, 896>}, {pipeline_mode = #tpu.pipeline_mode<synchronous>, transform_indices = @transform_4, window_bounds = array<i64: 32, 384>}, {pipeline_mode = #tpu.pipeline_mode<synchronous>, transform_indices = @transform_5, window_bounds = array<i64: 1, 384>}, {pipeline_mode = #tpu.pipeline_mode<synchronous>, transform_indices = @transform_6, window_bounds = array<i64: 384, 256>}, {pipeline_mode = #tpu.pipeline_mode<synchronous>, transform_indices = @transform_7, window_bounds = array<i64: 384, 256>}, {pipeline_mode = #tpu.pipeline_mode<synchronous>, transform_indices = @transform_8, window_bounds = array<i64: 1, 256>}, {pipeline_mode = #tpu.pipeline_mode<synchronous>, transform_indices = @transform_9, window_bounds = array<i64: 256, 128>}, {pipeline_mode = #tpu.pipeline_mode<synchronous>, transform_indices = @transform_10, window_bounds = array<i64: 1, 128>}, {pipeline_mode = #tpu.pipeline_mode<synchronous>, transform_indices = @transform_11, window_bounds = array<i64: 256, 256>}, {pipeline_mode = #tpu.pipeline_mode<synchronous>, transform_indices = @transform_12, window_bounds = array<i64: 1, 256>}, {pipeline_mode = #tpu.pipeline_mode<synchronous>, transform_indices = @transform_13, window_bounds = array<i64: 256, 256>}, {pipeline_mode = #tpu.pipeline_mode<synchronous>, transform_indices = @transform_14, window_bounds = array<i64: 1, 256>}, {pipeline_mode = #tpu.pipeline_mode<synchronous>, transform_indices = @transform_15, window_bounds = array<i64: 256, 384>}, {pipeline_mode = #tpu.pipeline_mode<synchronous>, transform_indices = @transform_16, window_bounds = array<i64: 256, 384>}, {pipeline_mode = #tpu.pipeline_mode<synchronous>, transform_indices = @transform_17, window_bounds = array<i64: 1, 384>}, {transform_indices = @transform_18, window_bounds = array<i64: 8, 384>}, {transform_indices = @transform_19, window_bounds = array<i64: 8, 384>}, {transform_indices = @transform_20, window_bounds = array<i64: 8, 128>}]} {
    %c0 = arith.constant 0 : index
    %c0_0 = arith.constant 0 : index
    %0 = vector.load %arg1[%c0, %c0_0] : memref<8x32xf32, #tpu.memory_space<vmem>>, vector<8x32xf32>
    %1 = arith.truncf %0 : vector<8x32xf32> to vector<8x32xbf16>
    %c0_1 = arith.constant 0 : index
    %c0_2 = arith.constant 0 : index
    %2 = vector.load %arg2[%c0_1, %c0_2] : memref<8x32xf32, #tpu.memory_space<vmem>>, vector<8x32xf32>
    %3 = arith.truncf %2 : vector<8x32xf32> to vector<8x32xbf16>
    %c0_3 = arith.constant 0 : index
    %c0_4 = arith.constant 0 : index
    %4 = vector.load %arg3[%c0_3, %c0_4] : memref<32x896xbf16, #tpu.memory_space<vmem>>, vector<32x896xbf16>
    %cst = arith.constant dense<0.000000e+00> : vector<8x896xf32>
    %5 = tpu.matmul %1, %4, %cst {dimension_numbers = #tpu.dot_dimension_numbers<[1], [0], [0], [1], [0, 0, 1, 1], [], []>} : vector<8x32xbf16>, vector<32x896xbf16>, vector<8x896xf32> -> vector<8x896xf32>
    %c0_5 = arith.constant 0 : index
    %c0_6 = arith.constant 0 : index
    %6 = vector.load %arg4[%c0_5, %c0_6] : memref<1x896xf32, #tpu.memory_space<vmem>>, vector<1x896xf32>
    %7 = vector.broadcast %6 : vector<1x896xf32> to vector<8x896xf32>
    %8 = arith.addf %5, %7 : vector<8x896xf32>
    %9 = vector.extract_strided_slice %8 {offsets = [0, 0], sizes = [8, 384], strides = [1, 1]} : vector<8x896xf32> to vector<8x384xf32>
    %10 = vector.extract_strided_slice %8 {offsets = [0, 384], sizes = [8, 256], strides = [1, 1]} : vector<8x896xf32> to vector<8x256xf32>
    %cst_7 = arith.constant 0.000000e+00 : f32
    %11 = vector.broadcast %cst_7 : f32 to vector<8x256xf32>
    %12 = arith.maximumf %10, %11 : vector<8x256xf32>
    %13 = vector.extract_strided_slice %8 {offsets = [0, 640], sizes = [8, 256], strides = [1, 1]} : vector<8x896xf32> to vector<8x256xf32>
    %cst_8 = arith.constant 0.000000e+00 : f32
    %14 = vector.broadcast %cst_8 : f32 to vector<8x256xf32>
    %15 = arith.maximumf %13, %14 : vector<8x256xf32>
    %c0_9 = arith.constant 0 : index
    %c0_10 = arith.constant 0 : index
    %16 = vector.load %arg5[%c0_9, %c0_10] : memref<32x384xbf16, #tpu.memory_space<vmem>>, vector<32x384xbf16>
    %cst_11 = arith.constant dense<0.000000e+00> : vector<8x384xf32>
    %17 = tpu.matmul %3, %16, %cst_11 {dimension_numbers = #tpu.dot_dimension_numbers<[1], [0], [0], [1], [0, 0, 1, 1], [], []>} : vector<8x32xbf16>, vector<32x384xbf16>, vector<8x384xf32> -> vector<8x384xf32>
    %c0_12 = arith.constant 0 : index
    %c0_13 = arith.constant 0 : index
    %18 = vector.load %arg6[%c0_12, %c0_13] : memref<1x384xf32, #tpu.memory_space<vmem>>, vector<1x384xf32>
    %19 = vector.broadcast %18 : vector<1x384xf32> to vector<8x384xf32>
    %20 = arith.addf %17, %19 : vector<8x384xf32>
    %c0_14 = arith.constant 0 : index
    %c0_15 = arith.constant 0 : index
    %21 = vector.load %arg19[%c0_14, %c0_15] : memref<8x384xf32, #tpu.memory_space<vmem>>, vector<8x384xf32>
    tpu.vector_store %arg19[%c0_14, %c0_15], %9 {strides = array<i32>} : memref<8x384xf32, #tpu.memory_space<vmem>>, vector<8x384xf32>,
    %c0_16 = arith.constant 0 : index
    %c0_17 = arith.constant 0 : index
    %22 = vector.load %arg20[%c0_16, %c0_17] : memref<8x384xf32, #tpu.memory_space<vmem>>, vector<8x384xf32>
    tpu.vector_store %arg20[%c0_16, %c0_17], %20 {strides = array<i32>} : memref<8x384xf32, #tpu.memory_space<vmem>>, vector<8x384xf32>,
    %23 = arith.truncf %9 : vector<8x384xf32> to vector<8x384xbf16>
    %c0_18 = arith.constant 0 : index
    %c0_19 = arith.constant 0 : index
    %24 = vector.load %arg7[%c0_18, %c0_19] : memref<384x256xbf16, #tpu.memory_space<vmem>>, vector<384x256xbf16>
    %cst_20 = arith.constant dense<0.000000e+00> : vector<8x256xf32>
    %25 = tpu.matmul %23, %24, %cst_20 {dimension_numbers = #tpu.dot_dimension_numbers<[1], [0], [0], [1], [0, 0, 1, 1], [], []>} : vector<8x384xbf16>, vector<384x256xbf16>, vector<8x256xf32> -> vector<8x256xf32>
    %26 = arith.truncf %20 : vector<8x384xf32> to vector<8x384xbf16>
    %c0_21 = arith.constant 0 : index
    %c0_22 = arith.constant 0 : index
    %27 = vector.load %arg8[%c0_21, %c0_22] : memref<384x256xbf16, #tpu.memory_space<vmem>>, vector<384x256xbf16>
    %cst_23 = arith.constant dense<0.000000e+00> : vector<8x256xf32>
    %28 = tpu.matmul %26, %27, %cst_23 {dimension_numbers = #tpu.dot_dimension_numbers<[1], [0], [0], [1], [0, 0, 1, 1], [], []>} : vector<8x384xbf16>, vector<384x256xbf16>, vector<8x256xf32> -> vector<8x256xf32>
    %29 = arith.addf %25, %28 : vector<8x256xf32>
    %c0_24 = arith.constant 0 : index
    %c0_25 = arith.constant 0 : index
    %30 = vector.load %arg9[%c0_24, %c0_25] : memref<1x256xf32, #tpu.memory_space<vmem>>, vector<1x256xf32>
    %31 = vector.broadcast %30 : vector<1x256xf32> to vector<8x256xf32>
    %32 = arith.addf %29, %31 : vector<8x256xf32>
    %cst_26 = arith.constant 0.000000e+00 : f32
    %33 = vector.broadcast %cst_26 : f32 to vector<8x256xf32>
    %34 = arith.maximumf %32, %33 : vector<8x256xf32>
    %35 = arith.truncf %34 : vector<8x256xf32> to vector<8x256xbf16>
    %c0_27 = arith.constant 0 : index
    %c0_28 = arith.constant 0 : index
    %36 = vector.load %arg10[%c0_27, %c0_28] : memref<256x128xbf16, #tpu.memory_space<vmem>>, vector<256x128xbf16>
    %cst_29 = arith.constant dense<0.000000e+00> : vector<8x128xf32>
    %37 = tpu.matmul %35, %36, %cst_29 {dimension_numbers = #tpu.dot_dimension_numbers<[1], [0], [0], [1], [0, 0, 1, 1], [], []>} : vector<8x256xbf16>, vector<256x128xbf16>, vector<8x128xf32> -> vector<8x128xf32>
    %c0_30 = arith.constant 0 : index
    %c0_31 = arith.constant 0 : index
    %38 = vector.load %arg11[%c0_30, %c0_31] : memref<1x128xf32, #tpu.memory_space<vmem>>, vector<1x128xf32>
    %39 = vector.broadcast %38 : vector<1x128xf32> to vector<8x128xf32>
    %40 = arith.addf %37, %39 : vector<8x128xf32>
    %41 = arith.truncf %12 : vector<8x256xf32> to vector<8x256xbf16>
    %c0_32 = arith.constant 0 : index
    %c0_33 = arith.constant 0 : index
    %42 = vector.load %arg12[%c0_32, %c0_33] : memref<256x256xbf16, #tpu.memory_space<vmem>>, vector<256x256xbf16>
    %cst_34 = arith.constant dense<0.000000e+00> : vector<8x256xf32>
    %43 = tpu.matmul %41, %42, %cst_34 {dimension_numbers = #tpu.dot_dimension_numbers<[1], [0], [0], [1], [0, 0, 1, 1], [], []>} : vector<8x256xbf16>, vector<256x256xbf16>, vector<8x256xf32> -> vector<8x256xf32>
    %c0_35 = arith.constant 0 : index
    %c0_36 = arith.constant 0 : index
    %44 = vector.load %arg13[%c0_35, %c0_36] : memref<1x256xf32, #tpu.memory_space<vmem>>, vector<1x256xf32>
    %45 = vector.broadcast %44 : vector<1x256xf32> to vector<8x256xf32>
    %46 = arith.addf %43, %45 : vector<8x256xf32>
    %cst_37 = arith.constant 0.000000e+00 : f32
    %47 = vector.broadcast %cst_37 : f32 to vector<8x256xf32>
    %48 = arith.maximumf %46, %47 : vector<8x256xf32>
    %49 = arith.truncf %15 : vector<8x256xf32> to vector<8x256xbf16>
    %c0_38 = arith.constant 0 : index
    %c0_39 = arith.constant 0 : index
    %50 = vector.load %arg14[%c0_38, %c0_39] : memref<256x256xbf16, #tpu.memory_space<vmem>>, vector<256x256xbf16>
    %cst_40 = arith.constant dense<0.000000e+00> : vector<8x256xf32>
    %51 = tpu.matmul %49, %50, %cst_40 {dimension_numbers = #tpu.dot_dimension_numbers<[1], [0], [0], [1], [0, 0, 1, 1], [], []>} : vector<8x256xbf16>, vector<256x256xbf16>, vector<8x256xf32> -> vector<8x256xf32>
    %c0_41 = arith.constant 0 : index
    %c0_42 = arith.constant 0 : index
    %52 = vector.load %arg15[%c0_41, %c0_42] : memref<1x256xf32, #tpu.memory_space<vmem>>, vector<1x256xf32>
    %53 = vector.broadcast %52 : vector<1x256xf32> to vector<8x256xf32>
    %54 = arith.addf %51, %53 : vector<8x256xf32>
    %cst_43 = arith.constant 0.000000e+00 : f32
    %55 = vector.broadcast %cst_43 : f32 to vector<8x256xf32>
    %56 = arith.maximumf %54, %55 : vector<8x256xf32>
    %57 = arith.truncf %56 : vector<8x256xf32> to vector<8x256xbf16>
    %c0_44 = arith.constant 0 : index
    %c0_45 = arith.constant 0 : index
    %58 = vector.load %arg17[%c0_44, %c0_45] : memref<256x384xbf16, #tpu.memory_space<vmem>>, vector<256x384xbf16>
    %cst_46 = arith.constant dense<0.000000e+00> : vector<8x384xf32>
    %59 = tpu.matmul %57, %58, %cst_46 {dimension_numbers = #tpu.dot_dimension_numbers<[1], [0], [0], [1], [0, 0, 1, 1], [], []>} : vector<8x256xbf16>, vector<256x384xbf16>, vector<8x384xf32> -> vector<8x384xf32>
    %60 = arith.truncf %48 : vector<8x256xf32> to vector<8x256xbf16>
    %c0_47 = arith.constant 0 : index
    %c0_48 = arith.constant 0 : index
    %61 = vector.load %arg16[%c0_47, %c0_48] : memref<256x384xbf16, #tpu.memory_space<vmem>>, vector<256x384xbf16>
    %cst_49 = arith.constant dense<0.000000e+00> : vector<8x384xf32>
    %62 = tpu.matmul %60, %61, %cst_49 {dimension_numbers = #tpu.dot_dimension_numbers<[1], [0], [0], [1], [0, 0, 1, 1], [], []>} : vector<8x256xbf16>, vector<256x384xbf16>, vector<8x384xf32> -> vector<8x384xf32>
    %63 = arith.subf %59, %62 : vector<8x384xf32>
    %c0_50 = arith.constant 0 : index
    %c0_51 = arith.constant 0 : index
    %64 = vector.load %arg18[%c0_50, %c0_51] : memref<1x384xf32, #tpu.memory_space<vmem>>, vector<1x384xf32>
    %65 = vector.broadcast %64 : vector<1x384xf32> to vector<8x384xf32>
    %66 = arith.addf %63, %65 : vector<8x384xf32>
    %67 = arith.mulf %66, %66 : vector<8x384xf32>
    %cst_52 = arith.constant dense<0.000000e+00> : vector<8xf32>
    %68 = vector.multi_reduction <add>, %67, %cst_52 [1] : vector<8x384xf32> to vector<8xf32>
    %69 = vector.shape_cast %68 : vector<8xf32> to vector<8x1xf32>
    %cst_53 = arith.constant 0.00347222225 : f32
    %70 = vector.broadcast %cst_53 : f32 to vector<8x1xf32>
    %71 = arith.mulf %69, %70 : vector<8x1xf32>
    %72 = tpu.iota {dimensions = array<i32: 1>} : vector<8x128xi32>
    %c127_i32 = arith.constant 127 : i32
    %73 = vector.broadcast %c127_i32 : i32 to vector<8x128xi32>
    %74 = arith.cmpi eq, %72, %73 : vector<8x128xi32>
    %75 = vector.shape_cast %71 : vector<8x1xf32> to vector<8x1xf32>
    %76 = vector.broadcast %75 : vector<8x1xf32> to vector<8x128xf32>
    %77 = arith.select %74, %76, %40 : vector<8x128xi1>, vector<8x128xf32>
    %c0_54 = arith.constant 0 : index
    %c0_55 = arith.constant 0 : index
    %78 = vector.load %arg21[%c0_54, %c0_55] : memref<8x128xf32, #tpu.memory_space<vmem>>, vector<8x128xf32>
    tpu.vector_store %arg21[%c0_54, %c0_55], %77 {strides = array<i32>} : memref<8x128xf32, #tpu.memory_space<vmem>>, vector<8x128xf32>,
    return
  }
  func.func @transform_0(%arg0: i32) -> (i32, i32) {
    %c0_i32 = arith.constant 0 : i32
    %c0_i32_0 = arith.constant 0 : i32
    return %arg0, %c0_i32 : i32, i32
  }
  func.func @transform_1(%arg0: i32) -> (i32, i32) {
    %c0_i32 = arith.constant 0 : i32
    %c0_i32_0 = arith.constant 0 : i32
    return %arg0, %c0_i32 : i32, i32
  }
  func.func @transform_2(%arg0: i32) -> (i32, i32) {
    %c0_i32 = arith.constant 0 : i32
    %c0_i32_0 = arith.constant 0 : i32
    %c0_i32_1 = arith.constant 0 : i32
    return %c0_i32, %c0_i32_0 : i32, i32
  }
  func.func @transform_3(%arg0: i32) -> (i32, i32) {
    %c0_i32 = arith.constant 0 : i32
    %c0_i32_0 = arith.constant 0 : i32
    %c0_i32_1 = arith.constant 0 : i32
    return %c0_i32, %c0_i32_0 : i32, i32
  }
  func.func @transform_4(%arg0: i32) -> (i32, i32) {
    %c0_i32 = arith.constant 0 : i32
    %c0_i32_0 = arith.constant 0 : i32
    %c0_i32_1 = arith.constant 0 : i32
    return %c0_i32, %c0_i32_0 : i32, i32
  }
  func.func @transform_5(%arg0: i32) -> (i32, i32) {
    %c0_i32 = arith.constant 0 : i32
    %c0_i32_0 = arith.constant 0 : i32
    %c0_i32_1 = arith.constant 0 : i32
    return %c0_i32, %c0_i32_0 : i32, i32
  }
  func.func @transform_6(%arg0: i32) -> (i32, i32) {
    %c0_i32 = arith.constant 0 : i32
    %c0_i32_0 = arith.constant 0 : i32
    %c0_i32_1 = arith.constant 0 : i32
    return %c0_i32, %c0_i32_0 : i32, i32
  }
  func.func @transform_7(%arg0: i32) -> (i32, i32) {
    %c0_i32 = arith.constant 0 : i32
    %c0_i32_0 = arith.constant 0 : i32
    %c0_i32_1 = arith.constant 0 : i32
    return %c0_i32, %c0_i32_0 : i32, i32
  }
  func.func @transform_8(%arg0: i32) -> (i32, i32) {
    %c0_i32 = arith.constant 0 : i32
    %c0_i32_0 = arith.constant 0 : i32
    %c0_i32_1 = arith.constant 0 : i32
    return %c0_i32, %c0_i32_0 : i32, i32
  }
  func.func @transform_9(%arg0: i32) -> (i32, i32) {
    %c0_i32 = arith.constant 0 : i32
    %c0_i32_0 = arith.constant 0 : i32
    %c0_i32_1 = arith.constant 0 : i32
    return %c0_i32, %c0_i32_0 : i32, i32
  }
  func.func @transform_10(%arg0: i32) -> (i32, i32) {
    %c0_i32 = arith.constant 0 : i32
    %c0_i32_0 = arith.constant 0 : i32
    %c0_i32_1 = arith.constant 0 : i32
    return %c0_i32, %c0_i32_0 : i32, i32
  }
  func.func @transform_11(%arg0: i32) -> (i32, i32) {
    %c0_i32 = arith.constant 0 : i32
    %c0_i32_0 = arith.constant 0 : i32
    %c0_i32_1 = arith.constant 0 : i32
    return %c0_i32, %c0_i32_0 : i32, i32
  }
  func.func @transform_12(%arg0: i32) -> (i32, i32) {
    %c0_i32 = arith.constant 0 : i32
    %c0_i32_0 = arith.constant 0 : i32
    %c0_i32_1 = arith.constant 0 : i32
    return %c0_i32, %c0_i32_0 : i32, i32
  }
  func.func @transform_13(%arg0: i32) -> (i32, i32) {
    %c0_i32 = arith.constant 0 : i32
    %c0_i32_0 = arith.constant 0 : i32
    %c0_i32_1 = arith.constant 0 : i32
    return %c0_i32, %c0_i32_0 : i32, i32
  }
  func.func @transform_14(%arg0: i32) -> (i32, i32) {
    %c0_i32 = arith.constant 0 : i32
    %c0_i32_0 = arith.constant 0 : i32
    %c0_i32_1 = arith.constant 0 : i32
    return %c0_i32, %c0_i32_0 : i32, i32
  }
  func.func @transform_15(%arg0: i32) -> (i32, i32) {
    %c0_i32 = arith.constant 0 : i32
    %c0_i32_0 = arith.constant 0 : i32
    %c0_i32_1 = arith.constant 0 : i32
    return %c0_i32, %c0_i32_0 : i32, i32
  }
  func.func @transform_16(%arg0: i32) -> (i32, i32) {
    %c0_i32 = arith.constant 0 : i32
    %c0_i32_0 = arith.constant 0 : i32
    %c0_i32_1 = arith.constant 0 : i32
    return %c0_i32, %c0_i32_0 : i32, i32
  }
  func.func @transform_17(%arg0: i32) -> (i32, i32) {
    %c0_i32 = arith.constant 0 : i32
    %c0_i32_0 = arith.constant 0 : i32
    %c0_i32_1 = arith.constant 0 : i32
    return %c0_i32, %c0_i32_0 : i32, i32
  }
  func.func @transform_18(%arg0: i32) -> (i32, i32) {
    %c0_i32 = arith.constant 0 : i32
    %c0_i32_0 = arith.constant 0 : i32
    return %arg0, %c0_i32 : i32, i32
  }
  func.func @transform_19(%arg0: i32) -> (i32, i32) {
    %c0_i32 = arith.constant 0 : i32
    %c0_i32_0 = arith.constant 0 : i32
    return %arg0, %c0_i32 : i32, i32
  }
  func.func @transform_20(%arg0: i32) -> (i32, i32) {
    %c0_i32 = arith.constant 0 : i32
    %c0_i32_0 = arith.constant 0 : i32
    return %arg0, %c0_i32 : i32, i32
  }
}

</mosaic_0001>

<bundles_post_ra>
// kernel: _deir_rnd_call.1
= control target key start
LH: loop header
LB: loop body
LE: loop exit
PB: predicated region body
PF: predicated region fallthrough
CT: control target
= control target key end

     0   :  { %s6178_s0 = inlined_call_operand.hbm [shape: f32[16,32], index: 0, kind: input, shape index: {}]   ;;  %s6179_s1 = inlined_call_operand.hbm [shape: f32[16,32], index: 1, kind: input, shape index: {}]   ;;  %s6180_s2 = inlined_call_operand.hbm [shape: bf16[32,896], index: 2, kind: input, shape index: {}]   ;;  %s6181_s3 = inlined_call_operand.vmem [shape: f32[1,896], index: 3, kind: input, shape index: {}]   ;;  %s6182_s4 = inlined_call_operand.hbm [shape: bf16[32,384], index: 4, kind: input, shape index: {}]   ;;  %s6183_s5 = inlined_call_operand.vmem [shape: f32[1,384], index: 5, kind: input, shape index: {}]   ;;  %s6184_s6 = inlined_call_operand.hbm [shape: bf16[384,256], index: 6, kind: input, shape index: {}]   ;;  %s6185_s7 = inlined_call_operand.hbm [shape: bf16[384,256], index: 7, kind: input, shape index: {}]   ;;  %s6186_s8 = inlined_call_operand.vmem [shape: f32[1,256], index: 8, kind: input, shape index: {}]   ;;  %s6187_s9 = inlined_call_operand.hbm [shape: bf16[256,128], index: 9, kind: input, shape index: {}]   ;;  %s6188_s10 = inlined_call_operand.vmem [shape: f32[1,128], index: 10, kind: input, shape index: {}]   ;;  %s6189_s11 = inlined_call_operand.hbm [shape: bf16[256,256], index: 11, kind: input, shape index: {}]   ;;  %s6190_s12 = inlined_call_operand.vmem [shape: f32[1,256], index: 12, kind: input, shape index: {}]   ;;  %s6191_s13 = inlined_call_operand.hbm [shape: bf16[256,256], index: 13, kind: input, shape index: {}]   ;;  %s6192_s14 = inlined_call_operand.vmem [shape: f32[1,256], index: 14, kind: input, shape index: {}]   ;;  %s6193_s15 = inlined_call_operand.hbm [shape: bf16[256,384], index: 15, kind: input, shape index: {}]   ;;  %s6194_s16 = inlined_call_operand.hbm [shape: bf16[256,384], index: 16, kind: input, shape index: {}]   ;;  %s6195_s17 = inlined_call_operand.hbm [shape: f32[1,384], index: 17, kind: input, shape index: {}]   ;;  %s6196_s18 = inlined_call_operand.hbm [shape: f32[16,384], index: 18, kind: output, shape index: {0}]   ;;  %s6197_s19 = inlined_call_operand.hbm [shape: f32[16,384], index: 19, kind: output, shape index: {1}]   ;;  %s6198_s20 = inlined_call_operand.hbm [shape: f32[16,128], index: 20, kind: output, shape index: {2}]  }
   0x1   :  { %6220 = sst [smem:[#allocation36_spill]] %s6178_s0 }
   0x2   :  { %6221 = sst [smem:[#allocation37_spill]] %s6179_s1 }
   0x3   :  { %6222 = sst [smem:[#allocation38_spill]] %s6180_s2 }
   0x4   :  { %6223 = sst [smem:[#allocation39_spill]] %s6181_s3 }
   0x5   :  { %6224 = sst [smem:[#allocation40_spill]] %s6182_s4 }
   0x6   :  { %6225 = sst [smem:[#allocation41_spill]] %s6183_s5 }
   0x7   :  { %6226 = sst [smem:[#allocation42_spill]] %s6184_s6 }
   0x8   :  { %6227 = sst [smem:[#allocation43_spill]] %s6185_s7 }
   0x9   :  { %6228 = sst [smem:[#allocation44_spill]] %s6186_s8 }
   0xa   :  { %6229 = sst [smem:[#allocation45_spill]] %s6187_s9 }
   0xb   :  { %6230 = sst [smem:[#allocation46_spill]] %s6188_s10 }
   0xc   :  { %6231 = sst [smem:[#allocation47_spill]] %s6189_s11 }
   0xd   :  { %6232 = sst [smem:[#allocation48_spill]] %s6190_s12 }
   0xe   :  { %6233 = sst [smem:[#allocation49_spill]] %s6191_s13 }
   0xf   :  { %6234 = sst [smem:[#allocation50_spill]] %s6192_s14 }
  0x10   :  { %6235 = sst [smem:[#allocation51_spill]] %s6193_s15 }
  0x11   :  { %6236 = sst [smem:[#allocation52_spill]] %s6196_s18 }
  0x12   :  { %6237 = sst [smem:[#allocation53_spill]] %s6197_s19 }
  0x13   :  { %6238 = sst [smem:[#allocation54_spill]] %s6198_s20 }
  0x14   :  { %26 = vsyncpa [#allocation3], 0 }
  0x15   :  { %28 = vsyncpa [#allocation3 + $0x1], 0 }
  0x16   :  { %29 = vsyncpa [#allocation6], 0 }
  0x17   :  { %31 = vsyncpa [#allocation6 + $0x1], 0 }
  0x18   :  { %32 = vsyncpa [#allocation9], 0 }
  0x19   :  { %33 = vsyncpa [#allocation12], 0 }
  0x1a   :  { %34 = vsyncpa [#allocation15], 0 }
  0x1b   :  { %35 = vsyncpa [#allocation18], 0 }
  0x1c   :  { %36 = vsyncpa [#allocation21], 0 }
  0x1d   :  { %37 = vsyncpa [#allocation4], 0 }
  0x1e   :  { %39 = vsyncpa [#allocation4 + $0x1], 0 }
  0x1f   :  { %40 = vsyncpa [#allocation24], 0 }
  0x20   :  { %42 = vsyncpa [#allocation24 + $0x1], 0  ;;  %s5510_s1 = smov 0   ;;  %s5512_s22 = smov 0  }
  0x21   :  { %s5514_s23 = smov 0   ;;  %s5516_s24 = smov 0  }
  0x22 LB: > { %s5379_s2 = smov [#allocation7]   ;;  %s5531_s3 = sadd.s32 4294967295, %s5377_s24   ;;  %s5377_s24 = sphi %s5516_s24, %s6292_s24   ;;  %s5373_s23 = sphi %s5514_s23, %s6291_s23   ;;  %s5369_s22 = sphi %s5512_s22, %s6290_s22   ;;  %s5365_s1 = sphi %s5510_s1, %s6289_s1  }
  0x23   : > { %s531_s25 = sshll.u32 %s5379_s2, 4  ;;  %p3872_p0 = scmp.ge.s32.totalorder %s5377_s24, 1  ;;  %s5536_s25 = int_to_ptr.vmem [resolvable:$true] %s531_s25 }
  0x24   : > { %p6207_p1 = scmp.eq.s32.totalorder %s5531_s3, 0  ;;  %p519_p2 = scmp.lt.s32.totalorder %s5377_s24, 3 }
  0x25   : > { %s5380_s27 = smov [#allocation8]   ;;  %s6241_s0 = sld [smem:[#allocation38_spill]] }
  0x26   : > { %p5538_p3 = pnand %p3872_p0, %p519_p2  ;;  %s547_s28 = sshll.u32 %s5380_s27, 4  ;;  %s5551_s28 = int_to_ptr.vmem [resolvable:$true] %s547_s28 }
  0x28   : > { %s6239_s26 = scalar_select %p5538_p3, 1, 0 }
  0x29   : > { %p4348_p5 = pneg %p5538_p3 }
  0x2b   : > { %p5547_p6 = pnand %p4348_p5, %p6207_p1  ;;  %s4883_s21 = scalar_lea.hbm %s6241_s0, 1792 }
  0x2c   : > { %p4884_p7 = scmp.ne.s32.totalorder %s6241_s0, %s4883_s21  ;;  %p4890_p11 = scmp.lt.u32.totalorder %s4883_s21, %s6241_s0 }
  0x2d   : > { %p5561_p8 = pneg %p5547_p6 }
  0x2f   : > { %p4886_p9 = pnand %p5561_p8, %p4884_p7 }
  0x31   : > { %p4887_p10 = pneg %p4886_p9 }
  0x33   : > { %p4892_p12 = pnand %p4890_p11, %p4887_p10 }
  0x35   : > { %4895 = shalt.err (!%p4892_p12)
}
  0x36   : > { %s4896_s20 = scalar_lea.vmem %s5536_s25, 1792  ;;  %p4904_p5 = scmp.lt.s32.totalorder %s5536_s25, %s5536_s25 }
  0x37   : > { %p4897_p13 = scmp.ne.s32.totalorder %s5536_s25, %s4896_s20  ;;  %p4905_p4 = scmp.lt.s32.totalorder %s4896_s20, %s4896_s20 }
  0x39   : > { %p4899_p0 = pnand %p4897_p13, %p5561_p8  ;;  %p4906_p7 = por %p4905_p4, %p4904_p5 }
  0x3b   : > { %p4900_p2 = pneg %p4899_p0 }
  0x3d   : > { %p4907_p9 = pnand %p4906_p7, %p4900_p2 }
  0x3f   : > { %4910 = shalt.err (!%p4907_p9)
}
  0x40   : > { %s5381_s29 = smov 448   ;;  %s5382_s18 = smov 28  }
  0x41   : > { %4351 = dma.hbm_to_vmem [thread:$0]  (!%p5547_p6), %s6241_s0, 1792, %s5536_s25, [#allocation6], %s5381_s29, %s5381_s29, %s5382_s18  }
  0x42   : > { %s6243_s19 = sld [smem:[#allocation40_spill]] }
  0x48   : > { %s4911_s14 = scalar_lea.hbm %s6243_s19, 768 }
  0x49   : > { %p4912_p4 = scmp.ne.s32.totalorder %s6243_s19, %s4911_s14  ;;  %p4918_p12 = scmp.lt.u32.totalorder %s4911_s14, %s6243_s19 }
  0x4b   : > { %p4914_p10 = pnand %p4912_p4, %p5561_p8 }
  0x4d   : > { %p4915_p11 = pneg %p4914_p10 }
  0x4f   : > { %p4920_p13 = pnand %p4918_p12, %p4915_p11 }
  0x51   : > { %4923 = shalt.err (!%p4920_p13)
}
  0x52   : > { %s4924_s25 = scalar_lea.vmem %s5551_s28, 768  ;;  %p4932_p7 = scmp.lt.s32.totalorder %s5551_s28, %s5551_s28 }
  0x53   : > { %p4925_p0 = scmp.ne.s32.totalorder %s5551_s28, %s4924_s25  ;;  %p4933_p9 = scmp.lt.s32.totalorder %s4924_s25, %s4924_s25 }
  0x55   : > { %p4927_p2 = pnand %p4925_p0, %p5561_p8  ;;  %p4934_p4 = por %p4933_p9, %p4932_p7 }
  0x57   : > { %p4928_p5 = pneg %p4927_p2 }
  0x59   : > { %p4935_p10 = pnand %p4934_p4, %p4928_p5 }
  0x5b   : > { %4938 = shalt.err (!%p4935_p10)
}
  0x5c   : > { %s6209_s8 = smov 192   ;;  %s6211_s5 = smov 12  }
  0x5d   : > { %4354 = dma.hbm_to_vmem [thread:$0]  (!%p5547_p6), %s6243_s19, 768, %s5551_s28, [#allocation9], %s6209_s8, %s6209_s8, %s6211_s5  }
  0x5e   : > { %s5385_s29 = smov [#allocation11]   ;;  %s5386_s30 = smov [#allocation14]  }
  0x5f   : > { %s576_s18 = sshll.u32 %s5385_s29, 4  ;;  %s608_s21 = sshll.u32 %s5386_s30, 4  ;;  %s577_s18 = int_to_ptr.vmem [resolvable:$true] %s576_s18  ;;  %s5608_s21 = int_to_ptr.vmem [resolvable:$true] %s608_s21 }
  0x60   : > { %s6244_s7 = sld [smem:[#allocation43_spill]] }
  0x66   : > { %s4939_s20 = scalar_lea.hbm %s6244_s7, 6144 }
  0x67   : > { %p4940_p11 = scmp.ne.s32.totalorder %s6244_s7, %s4939_s20  ;;  %p4946_p0 = scmp.lt.u32.totalorder %s4939_s20, %s6244_s7 }
  0x69   : > { %p4942_p12 = pnand %p4940_p11, %p5561_p8 }
  0x6b   : > { %p4943_p13 = pneg %p4942_p12 }
  0x6d   : > { %p4948_p2 = pnand %p4946_p0, %p4943_p13 }
  0x6f   : > { %4951 = shalt.err (!%p4948_p2)
}
  0x70   : > { %s4952_s14 = scalar_lea.vmem %s577_s18, 6144  ;;  %p4960_p4 = scmp.lt.s32.totalorder %s577_s18, %s577_s18 }
  0x71   : > { %p4953_p5 = scmp.ne.s32.totalorder %s577_s18, %s4952_s14  ;;  %p4961_p10 = scmp.lt.s32.totalorder %s4952_s14, %s4952_s14 }
  0x73   : > { %p4955_p7 = pnand %p4953_p5, %p5561_p8  ;;  %p4962_p1 = por %p4961_p10, %p4960_p4 }
  0x75   : > { %p4956_p9 = pneg %p4955_p7 }
  0x77   : > { %p4963_p3 = pnand %p4962_p1, %p4956_p9 }
  0x79   : > { %4966 = shalt.err (!%p4963_p3)
}
  0x7a   : > { %s6213_s0 = smov 128   ;;  %s6215_s29 = smov 8  }
  0x7b   : > { %4360 = dma.hbm_to_vmem [thread:$0]  (!%p5547_p6), %s6244_s7, 6144, %s577_s18, [#allocation12], %s6213_s0, %s6213_s0, %s6215_s29  }
  0x7c   : > { %s6245_s11 = sld [smem:[#allocation47_spill]] }
  0x82   : > { %s4967_s25 = scalar_lea.hbm %s6245_s11, 4096 }
  0x83   : > { %p4968_p1 = scmp.ne.s32.totalorder %s6245_s11, %s4967_s25  ;;  %p4974_p12 = scmp.lt.u32.totalorder %s4967_s25, %s6245_s11 }
  0x85   : > { %p4970_p3 = pnand %p4968_p1, %p5561_p8 }
  0x87   : > { %p4971_p11 = pneg %p4970_p3 }
  0x89   : > { %p4976_p13 = pnand %p4974_p12, %p4971_p11 }
  0x8b   : > { %4979 = shalt.err (!%p4976_p13)
}
  0x8c   : > { %s4980_s18 = scalar_lea.vmem %s5608_s21, 4096  ;;  %p4988_p7 = scmp.lt.s32.totalorder %s5608_s21, %s5608_s21 }
  0x8d   : > { %p4981_p0 = scmp.ne.s32.totalorder %s5608_s21, %s4980_s18  ;;  %p4989_p9 = scmp.lt.s32.totalorder %s4980_s18, %s4980_s18 }
  0x8f   : > { %p4983_p2 = pnand %p4981_p0, %p5561_p8  ;;  %p4990_p4 = por %p4989_p9, %p4988_p7 }
  0x91   : > { %p4984_p5 = pneg %p4983_p2 }
  0x93   : > { %p4991_p10 = pnand %p4990_p4, %p4984_p5 }
  0x95   : > { %4994 = shalt.err (!%p4991_p10)
}
  0x96   : > { %4366 = dma.hbm_to_vmem [thread:$0]  (!%p5547_p6), %s6245_s11, 4096, %s5608_s21, [#allocation15], %s6213_s0, %s6213_s0, %s6215_s29  }
  0x97   : > { %s5389_s2 = smov [#allocation17]   ;;  %s5390_s20 = smov [#allocation10]  }
  0x98   : > { %s640_s27 = sshll.u32 %s5389_s2, 4  ;;  %s563_s25 = sshll.u32 %s5390_s20, 4  ;;  %s641_s27 = int_to_ptr.vmem [resolvable:$true] %s640_s27  ;;  %s5657_s25 = int_to_ptr.vmem [resolvable:$true] %s563_s25 }
  0x99   : > { %s6246_s15 = sld [smem:[#allocation51_spill]] }
  0x9f   : > { %s4995_s14 = scalar_lea.hbm %s6246_s15, 6144 }
  0xa0   : > { %p4996_p1 = scmp.ne.s32.totalorder %s6246_s15, %s4995_s14  ;;  %p5002_p12 = scmp.lt.u32.totalorder %s4995_s14, %s6246_s15 }
  0xa2   : > { %p4998_p3 = pnand %p4996_p1, %p5561_p8 }
  0xa4   : > { %p4999_p11 = pneg %p4998_p3 }
  0xa6   : > { %p5004_p13 = pnand %p5002_p12, %p4999_p11 }
  0xa8   : > { %5007 = shalt.err (!%p5004_p13)
}
  0xa9   : > { %s5008_s30 = scalar_lea.vmem %s641_s27, 6144  ;;  %p5016_p7 = scmp.lt.s32.totalorder %s641_s27, %s641_s27 }
  0xaa   : > { %p5009_p0 = scmp.ne.s32.totalorder %s641_s27, %s5008_s30  ;;  %p5017_p9 = scmp.lt.s32.totalorder %s5008_s30, %s5008_s30 }
  0xac   : > { %p5011_p2 = pnand %p5009_p0, %p5561_p8  ;;  %p5018_p4 = por %p5017_p9, %p5016_p7 }
  0xae   : > { %p5012_p5 = pneg %p5011_p2 }
  0xb0   : > { %p5019_p10 = pnand %p5018_p4, %p5012_p5 }
  0xb2   : > { %5022 = shalt.err (!%p5019_p10)
}
  0xb3   : > { %s6247_s5 = smov 12   ;;  %s6248_s2 = smov 192  }
  0xb4   : > { %4372 = dma.hbm_to_vmem [thread:$0]  (!%p5547_p6), %s6246_s15, 6144, %s641_s27, [#allocation18], %s6248_s2, %s6248_s2, %s6247_s5  }
  0xb5   : > { %s6249_s6 = sld [smem:[#allocation42_spill]] }
  0xbb   : > { %s5023_s18 = scalar_lea.hbm %s6249_s6, 6144 }
  0xbc   : > { %p5024_p1 = scmp.ne.s32.totalorder %s6249_s6, %s5023_s18  ;;  %p5030_p12 = scmp.lt.u32.totalorder %s5023_s18, %s6249_s6 }
  0xbe   : > { %p5026_p3 = pnand %p5024_p1, %p5561_p8 }
  0xc0   : > { %p5027_p11 = pneg %p5026_p3 }
  0xc2   : > { %p5032_p13 = pnand %p5030_p12, %p5027_p11 }
  0xc4   : > { %5035 = shalt.err (!%p5032_p13)
}
  0xc5   : > { %s5036_s27 = scalar_lea.vmem %s5657_s25, 6144  ;;  %p5044_p7 = scmp.lt.s32.totalorder %s5657_s25, %s5657_s25 }
  0xc6   : > { %p5037_p0 = scmp.ne.s32.totalorder %s5657_s25, %s5036_s27  ;;  %p5045_p9 = scmp.lt.s32.totalorder %s5036_s27, %s5036_s27 }
  0xc8   : > { %p5039_p2 = pnand %p5037_p0, %p5561_p8  ;;  %p5046_p4 = por %p5045_p9, %p5044_p7 }
  0xca   : > { %p5040_p5 = pneg %p5039_p2 }
  0xcc   : > { %p5047_p10 = pnand %p5046_p4, %p5040_p5 }
  0xce   : > { %5050 = shalt.err (!%p5047_p10)
}
  0xcf   : > { %s6250_s0 = smov 128   ;;  %s5391_s28 = smov [#allocation13]  }
  0xd0   : > { %4357 = dma.hbm_to_vmem [thread:$0]  (!%p5547_p6), %s6249_s6, 6144, %s5657_s25, [#allocation9], %s6250_s0, %s6250_s0, %s6215_s29  }
  0xd1   : > { %s592_s14 = sshll.u32 %s5391_s28, 4  ;;  %s6251_s9 = sld [smem:[#allocation45_spill]]  ;;  %s593_s14 = int_to_ptr.vmem [resolvable:$true] %s592_s14 }
  0xd7   : > { %s5051_s21 = scalar_lea.hbm %s6251_s9, 2048 }
  0xd8   : > { %p5052_p1 = scmp.ne.s32.totalorder %s6251_s9, %s5051_s21  ;;  %p5058_p12 = scmp.lt.u32.totalorder %s5051_s21, %s6251_s9 }
  0xda   : > { %p5054_p3 = pnand %p5052_p1, %p5561_p8 }
  0xdc   : > { %p5055_p11 = pneg %p5054_p3 }
  0xde   : > { %p5060_p13 = pnand %p5058_p12, %p5055_p11 }
  0xe0   : > { %5063 = shalt.err (!%p5060_p13)
}
  0xe1   : > { %s5064_s25 = scalar_lea.vmem %s593_s14, 2048  ;;  %p5072_p7 = scmp.lt.s32.totalorder %s593_s14, %s593_s14 }
  0xe2   : > { %p5065_p0 = scmp.ne.s32.totalorder %s593_s14, %s5064_s25  ;;  %p5073_p9 = scmp.lt.s32.totalorder %s5064_s25, %s5064_s25 }
  0xe4   : > { %p5067_p2 = pnand %p5065_p0, %p5561_p8  ;;  %p5074_p4 = por %p5073_p9, %p5072_p7 }
  0xe6   : > { %p5068_p5 = pneg %p5067_p2 }
  0xe8   : > { %p5075_p10 = pnand %p5074_p4, %p5068_p5 }
  0xea   : > { %5078 = shalt.err (!%p5075_p10)
}
  0xeb   : > { %s5392_s20 = smov 64   ;;  %s5393_s12 = smov 4  }
  0xec   : > { %4363 = dma.hbm_to_vmem [thread:$0]  (!%p5547_p6), %s6251_s9, 2048, %s593_s14, [#allocation12], %s5392_s20, %s5392_s20, %s5393_s12  }
  0xed   : > { %s5394_s28 = smov [#allocation16]   ;;  %s5395_s8 = smov [#allocation19]  }
  0xee   : > { %s624_s18 = sshll.u32 %s5394_s28, 4  ;;  %s653_s21 = sshll.u32 %s5395_s8, 4  ;;  %s625_s18 = int_to_ptr.vmem [resolvable:$true] %s624_s18  ;;  %s654_s21 = int_to_ptr.vmem [resolvable:$true] %s653_s21 }
  0xef   : > { %s6252_s13 = sld [smem:[#allocation49_spill]] }
  0xf5   : > { %s5079_s25 = scalar_lea.hbm %s6252_s13, 4096 }
  0xf6   : > { %p5080_p1 = scmp.ne.s32.totalorder %s6252_s13, %s5079_s25  ;;  %p5086_p12 = scmp.lt.u32.totalorder %s5079_s25, %s6252_s13 }
  0xf8   : > { %p5082_p3 = pnand %p5080_p1, %p5561_p8 }
  0xfa   : > { %p5083_p11 = pneg %p5082_p3 }
  0xfc   : > { %p5088_p13 = pnand %p5086_p12, %p5083_p11 }
  0xfe   : > { %5091 = shalt.err (!%p5088_p13)
}
  0xff   : > { %s5092_s14 = scalar_lea.vmem %s625_s18, 4096  ;;  %p5100_p7 = scmp.lt.s32.totalorder %s625_s18, %s625_s18 }
 0x100   : > { %p5093_p0 = scmp.ne.s32.totalorder %s625_s18, %s5092_s14  ;;  %p5101_p9 = scmp.lt.s32.totalorder %s5092_s14, %s5092_s14 }
 0x102   : > { %p5095_p2 = pnand %p5093_p0, %p5561_p8  ;;  %p5102_p4 = por %p5101_p9, %p5100_p7 }
 0x104   : > { %p5096_p5 = pneg %p5095_p2 }
 0x106   : > { %p5103_p10 = pnand %p5102_p4, %p5096_p5 }
 0x108   : > { %5106 = shalt.err (!%p5103_p10)
}
 0x109   : > { %s6253_s6 = smov 8   ;;  %s5107_s12 = scalar_lea.hbm %s6194_s16, 6144 }
 0x10a   : > { %4369 = dma.hbm_to_vmem [thread:$0]  (!%p5547_p6), %s6252_s13, 4096, %s625_s18, [#allocation15], %s6250_s0, %s6250_s0, %s6253_s6  }
 0x10b   : > { %p5108_p1 = scmp.ne.s32.totalorder %s6194_s16, %s5107_s12  ;;  %p5114_p12 = scmp.lt.u32.totalorder %s5107_s12, %s6194_s16 }
 0x10d   : > { %p5110_p3 = pnand %p5108_p1, %p5561_p8 }
 0x10f   : > { %p5111_p11 = pneg %p5110_p3 }
 0x111   : > { %p5116_p13 = pnand %p5114_p12, %p5111_p11 }
 0x113   : > { %5119 = shalt.err (!%p5116_p13)
}
 0x114   : > { %s5120_s30 = scalar_lea.vmem %s654_s21, 6144  ;;  %p5128_p7 = scmp.lt.s32.totalorder %s654_s21, %s654_s21 }
 0x115   : > { %p5121_p0 = scmp.ne.s32.totalorder %s654_s21, %s5120_s30  ;;  %p5129_p9 = scmp.lt.s32.totalorder %s5120_s30, %s5120_s30 }
 0x117   : > { %p5123_p2 = pnand %p5121_p0, %p5561_p8  ;;  %p5130_p4 = por %p5129_p9, %p5128_p7 }
 0x119   : > { %p5124_p5 = pneg %p5123_p2 }
 0x11b   : > { %p5131_p10 = pnand %p5130_p4, %p5124_p5 }
 0x11d   : > { %5134 = shalt.err (!%p5131_p10)
}
 0x11e   : > { %4375 = dma.hbm_to_vmem [thread:$0]  (!%p5547_p6), %s6194_s16, 6144, %s654_s21, [#allocation18], %s6248_s2, %s6248_s2, %s6247_s5  }
 0x11f   : > { %s5396_s27 = smov [#allocation20]   ;;  %s5135_s15 = scalar_lea.hbm %s6195_s17, 48 }
 0x120   : > { %s667_s25 = sshll.u32 %s5396_s27, 4  ;;  %p5136_p1 = scmp.ne.s32.totalorder %s6195_s17, %s5135_s15  ;;  %s668_s25 = int_to_ptr.vmem [resolvable:$true] %s667_s25 }
 0x121   : > { %p5142_p12 = scmp.lt.u32.totalorder %s5135_s15, %s6195_s17 }
 0x122   : > { %p5138_p3 = pnand %p5136_p1, %p5561_p8 }
 0x124   : > { %p5139_p11 = pneg %p5138_p3 }
 0x126   : > { %p5144_p13 = pnand %p5142_p12, %p5139_p11 }
 0x128   : > { %5147 = shalt.err (!%p5144_p13)
}
 0x129   : > { %s5148_s5 = scalar_lea.vmem %s668_s25, 48  ;;  %s5155_s2 = scalar_lea.vmem %s668_s25, 64 }
 0x12a   : > { %p5149_p0 = scmp.ne.s32.totalorder %s668_s25, %s5148_s5  ;;  %p5156_p7 = scmp.lt.s32.totalorder %s668_s25, %s668_s25 }
 0x12b   : > { %p5157_p9 = scmp.lt.s32.totalorder %s5155_s2, %s5148_s5 }
 0x12c   : > { %p5151_p2 = pnand %p5149_p0, %p5561_p8 }
 0x12d   : > { %p5158_p4 = por %p5157_p9, %p5156_p7 }
 0x12e   : > { %p5152_p5 = pneg %p5151_p2 }
 0x130   : > { %p5159_p10 = pnand %p5158_p4, %p5152_p5 }
 0x132   : > { %5162 = shalt.err (!%p5159_p10)
}
 0x133   : > { %4378 = dma.hbm_to_vmem [thread:$0]  (!%p5547_p6), %s6195_s17, 48, %s668_s25, [#allocation21]  }
 0x134   : > { %s6217_s10 = sadd.s32 4294967294, %s5377_s24   ;;  %s5786_s4 = sadd.s32 1, %s5377_s24  }
 0x135   : > { %s52_s11 = ssub.s32 %s5377_s24, %s5786_s4  ;;  %s55_s28 = sadd.s32 1, %s5373_s23 }
 0x136   : > { %p53_p8 = scmp.eq.s32.totalorder %s52_s11, 0  ;;  %p62_p1 = scmp.ne.s32.totalorder %s5373_s23, %s5369_s22 }
 0x137   : > { %p63_p3 = scmp.eq.s32.totalorder %s5377_s24, 0  ;;  %p68_p11 = scmp.ne.s32.totalorder %s5369_s22, %s5365_s1 }
 0x138   : > { %s5797_s8 = scalar_select %p53_p8, %s5373_s23, %s55_s28  }
 0x139   : > { %p5799_p12 = por %p63_p3, %p62_p1  ;;  %p6255_p13 = scmp.eq.s32.totalorder %s5531_s3, 0 }
 0x13a   : > { %p454_p0 = scmp.eq.s32.totalorder %s5531_s3, 1  ;;  %p460_p2 = scmp.eq.s32.totalorder %s6217_s10, 1 }
 0x13b   : > { %p5805_p6 = por %p6255_p13, %p68_p11  ;;  %p4406_p5 = scmp.lt.s32.totalorder %s5377_s24, 2 }
 0x13c   : > { %s678_s18 = sand.u32 1, %s5373_s23   ;;  %p5814_p7 = por %p454_p0, %p62_p1 }
 0x13d   : > { %s6256_s0 = scalar_select %p5805_p6, 1, 0 }
 0x13e   : > { %s6257_s27 = scalar_select %p5814_p7, 1, 0 }
 0x13f   : > { %p5818_p9 = por %p460_p2, %p68_p11  ;;  %s5822_s14 = sshll.u32 %s678_s18, 3 }
 0x140   : > { %s3885_s6 = sshll.u32 %s5377_s24, 7  ;;  %s6259_s29 = sld [smem:[#allocation36_spill]] }
 0x141   : > { %s6258_s25 = scalar_select %p5818_p9, 1, 0 }
 0x142   : > { %s682_s12 = scalar_lea.vmem [#allocation2], %s5822_s14  ;;  %p5835_p4 = pnand %p4406_p5, %p5799_p12 }
 0x143   : > { %s689_s5 = sshll.u32 %s682_s12, 4  ;;  %s6261_s11 = sld [smem:[#allocation37_spill]]  ;;  %s5831_s5 = int_to_ptr.vmem [resolvable:$true] %s689_s5 }
 0x144   : > { %s696_s15 = sand.u32 1, %s5377_s24   ;;  %s679_s19 = scalar_lea.sflag [#allocation3], %s678_s18 }
 0x145   : > { %p5165_p8 = pneg %p5835_p4 }
 0x146   : > { %s5828_s20 = scalar_lea.hbm %s6259_s29, %s3885_s6  ;;  %s5168_s9 = scalar_lea.hbm %s6259_s29, 256 }
 0x147   : > { %s5163_s10 = scalar_lea.hbm %s5828_s20, 128  ;;  %p5169_p11 = scmp.lt.u32.totalorder %s5828_s20, %s6259_s29 }
 0x148   : > { %p5164_p10 = scmp.ne.s32.totalorder %s5828_s20, %s5163_s10  ;;  %p5170_p12 = scmp.lt.u32.totalorder %s5168_s9, %s5163_s10 }
 0x149   : > { %s5842_s28 = scalar_lea.hbm %s6261_s11, %s3885_s6  ;;  %p5172_p0 = scmp.lt.u32.totalorder %s5163_s10, %s5828_s20 }
 0x14a   : > { %p5166_p1 = pnand %p5165_p8, %p5164_p10  ;;  %p5171_p13 = por %p5170_p12, %p5169_p11 }
 0x14c   : > { %p5167_p3 = pneg %p5166_p1  ;;  %p5173_p2 = por %p5172_p0, %p5171_p13 }
 0x14e   : > { %p5174_p5 = pnand %p5173_p2, %p5167_p3 }
 0x150   : > { %5177 = shalt.err (!%p5174_p5)
}
 0x151   : > { %s5178_s18 = scalar_lea.vmem %s5831_s5, 128  ;;  %s5397_s6 = smov [#allocation2]  }
 0x152   : > { %p5179_p10 = scmp.ne.s32.totalorder %s5831_s5, %s5178_s18  ;;  %s5183_s7 = sshll.u32 %s5397_s6, 4  ;;  %s5184_s7 = int_to_ptr.vmem [resolvable:$false] %s5183_s7 }
 0x153   : > { %s5185_s13 = scalar_lea.vmem %s5184_s7, 256  ;;  %p5186_p7 = scmp.lt.s32.totalorder %s5831_s5, %s5184_s7 }
 0x154   : > { %p5181_p1 = pnand %p5179_p10, %p5165_p8  ;;  %p5187_p11 = scmp.lt.s32.totalorder %s5185_s13, %s5178_s18 }
 0x156   : > { %p5182_p9 = pneg %p5181_p1  ;;  %p5188_p12 = por %p5187_p11, %p5186_p7 }
 0x158   : > { %p5189_p13 = pnand %p5188_p12, %p5182_p9 }
 0x15a   : > { %5192 = shalt.err (!%p5189_p13)
}
 0x15b   : > { %4382 = dma.hbm_to_vmem [thread:$0]  (!%p5835_p4), %s5828_s20, 128, %s5831_s5, %s679_s19  }
 0x15c   : > { %s700_s9 = scalar_lea.vmem [#allocation5], %s5822_s14  ;;  %s697_s30 = scalar_lea.sflag [#allocation6], %s696_s15 }
 0x15d   : > { %s707_s10 = sshll.u32 %s700_s9, 4  ;;  %s5193_s12 = scalar_lea.hbm %s5842_s28, 128  ;;  %s708_s10 = int_to_ptr.vmem [resolvable:$true] %s707_s10 }
 0x15e   : > { %p5194_p7 = scmp.ne.s32.totalorder %s5842_s28, %s5193_s12  ;;  %s5198_s6 = scalar_lea.hbm %s6261_s11, 256 }
 0x15f   : > { %p5199_p0 = scmp.lt.u32.totalorder %s5842_s28, %s6261_s11  ;;  %p5200_p2 = scmp.lt.u32.totalorder %s5198_s6, %s5193_s12 }
 0x160   : > { %p5196_p9 = pnand %p5194_p7, %p5165_p8  ;;  %p5202_p10 = scmp.lt.u32.totalorder %s5193_s12, %s5842_s28 }
 0x161   : > { %p5201_p5 = por %p5200_p2, %p5199_p0 }
 0x162   : > { %p5197_p3 = pneg %p5196_p9 }
 0x163   : > { %p5203_p1 = por %p5202_p10, %p5201_p5 }
 0x165   : > { %p5204_p11 = pnand %p5203_p1, %p5197_p3 }
 0x167   : > { %5207 = shalt.err (!%p5204_p11)
}
 0x168   : > { %s5208_s14 = scalar_lea.vmem %s708_s10, 128  ;;  %s5398_s20 = smov [#allocation5]  }
 0x169   : > { %p5209_p12 = scmp.ne.s32.totalorder %s708_s10, %s5208_s14  ;;  %s5213_s5 = sshll.u32 %s5398_s20, 4  ;;  %s5214_s5 = int_to_ptr.vmem [resolvable:$false] %s5213_s5 }
 0x16a   : > { %s5215_s15 = scalar_lea.vmem %s5214_s5, 256  ;;  %p5216_p9 = scmp.lt.s32.totalorder %s708_s10, %s5214_s5 }
 0x16b   : > { %p5211_p13 = pnand %p5209_p12, %p5165_p8  ;;  %p5217_p6 = scmp.lt.s32.totalorder %s5215_s15, %s5208_s14 }
 0x16d   : > { %p5212_p7 = pneg %p5211_p13  ;;  %p5218_p0 = por %p5217_p6, %p5216_p9 }
 0x16f   : > { %p5219_p2 = pnand %p5218_p0, %p5212_p7 }
 0x171   : > { %5222 = shalt.err (!%p5219_p2)
}
 0x172   : > { %4385 = dma.hbm_to_vmem [thread:$0]  (!%p5835_p4), %s5842_s28, 128, %s708_s10, %s697_s30  }
 0x173   : > { %p6262_p3 = scmp.ne.s32.totalorder %s6239_s26, 0 }
 0x174   : > { %s5895_s19 = sand.u32 (!%p6262_p3), 1, %s5369_s22   ;;  %p6263_p6 = scmp.ne.s32.totalorder (!%p6262_p3), %s6256_s0, 0 }
 0x175   : > { %716 = sbr.rel (%p6262_p3) target bundleno = 1678 (0x68e), region = 92  ;;  %s5898_s9 = sshll.u32 (!%p6262_p3), %s5895_s19, 3 }
 0x176   : > { %s719_s12 = scalar_lea.sflag (!%p6262_p3), [#allocation3], %s5895_s19  ;;  %s722_s21 = scalar_lea.vmem (!%p6262_p3), [#allocation2], %s5898_s9 }
 0x17c   : > { %5324 = dma.done.wait (%p6263_p6), %s719_s12, 128  }
 0x17d   : > { %5326 = vsyncadd (%p6263_p6), %s719_s12, 4294967168  ;;  %s727_s26 = sand.u32 1, %s5531_s3   ;;  %s731_s28 = scalar_lea.vmem [#allocation5], %s5898_s9 }
 0x17e   : > { %s728_s2 = scalar_lea.sflag [#allocation6], %s727_s26 }
 0x17f   : > { %5328 = dma.done.wait (%p6263_p6), %s728_s2, 128  }
 0x180   : > { %5330 = vsyncadd (%p6263_p6), %s728_s2, 4294967168  ;;  %p6264_p4 = scmp.eq.s32.totalorder %s5531_s3, 0 }
 0x182   : > { %5332 = dma.done.wait (%p6264_p4), [#allocation6], 1792   ;;  %p6265_p8 = pmov %p6264_p4 }
 0x183   : > { %p6266_p5 = pmov %p6264_p4 }
 0x184   : > { %5334 = vsyncadd (%p6265_p8), [#allocation6], 4294965504 }
 0x185   : > { %5336 = dma.done.wait (%p6266_p5), [#allocation9], 6912   ;;  %p6267_p10 = pmov %p6264_p4 }
 0x186   : > { %p6268_p1 = pmov %p6264_p4 }
 0x187   : > { %5338 = vsyncadd (%p6267_p10), [#allocation9], 4294960384 }
 0x188   : > { %5340 = dma.done.wait (%p6268_p1), [#allocation12], 8192   ;;  %p6269_p11 = pmov %p6268_p1 }
 0x189   : > { %p6270_p12 = pmov %p6268_p1 }
 0x18a   : > { %5342 = vsyncadd (%p6269_p11), [#allocation12], 4294959104 }
 0x18b   : > { %5344 = dma.done.wait (%p6270_p12), [#allocation15], 8192   ;;  %p6271_p13 = pmov %p6268_p1 }
 0x18c   : > { %p6272_p7 = pmov %p6268_p1 }
 0x18d   : > { %5346 = vsyncadd (%p6271_p13), [#allocation15], 4294959104 }
 0x18e   : > { %5348 = dma.done.wait (%p6272_p7), [#allocation18], 12288   ;;  %p6273_p9 = pmov %p6268_p1 }
 0x18f   : > { %p6274_p0 = pmov %p6268_p1 }
 0x190   : > { %5350 = vsyncadd (%p6273_p9), [#allocation18], 4294955008 }
 0x191   : > { %5352 = dma.done.wait (%p6274_p0), [#allocation21], 48   ;;  %p6275_p2 = pmov %p6274_p0 }
 0x192   : > { %v5399_v0 = vmov 0   ;;  %v4471_v1 = vld [vmem:[#allocation7 + $0x4] ss:$28 sps:$4 sm:$0xff]   ;;  %v4476_v4 = vld [vmem:[#allocation8] ss:$12 sps:$4 sm:$0xff]   ;;  %vm973_vm0 = vcmask 261120  }
 0x193   : > { %5354 = vsyncadd (%p6275_p2), [#allocation21], 4294967248  ;;  %1009 = vmatprep.mubr.bf16.mxu1 %v5399_v0  ;;  %1236 = vmatprep.mubr.bf16.mxu0 %v5399_v0  ;;  %v4473_v2 = vld [vmem:[#allocation8 + $0x4] ss:$12 sps:$4 sm:$0xff]   ;;  %v4477_v5 = vld [vmem:[#allocation7 + $0x3c] ss:$28 sps:$4 sm:$0xff]  }
 0x194   : > { %977 = vmatprep.subr.bf16.mxu1 %v4471_v1  ;;  %v4475_v3 = vld [vmem:[#allocation7] ss:$28 sps:$4 sm:$0xff]   ;;  %1204 = vmatprep.subr.bf16.mxu0 %v4473_v2  ;;  %v4479_v6 = vld [vmem:[#allocation8 + $0x1c] ss:$12 sps:$4 sm:$0xff]   ;;  %v4482_v8 = vld [vmem:[#allocation8 + $0x18] ss:$12 sps:$4 sm:$0xff]  }
 0x195   : > { %978 = vmatpush1.bf16.msra.mxu1 %v4475_v3  ;;  %1205 = vmatpush1.bf16.msra.mxu0 %v4476_v4  ;;  %v4481_v7 = vld [vmem:[#allocation7 + $0x38] ss:$28 sps:$4 sm:$0xff]   ;;  %v844_v9 = vld [vmem:[%s722_s21] sm:$0xff]  ;;  %v5400_v28 = vmov 0.0   ;;  %vm5401_vm1 = vmmov 0   ;;  %s6276_s30 = sld [smem:[#allocation39_spill]] }
 0x196   : > { %979 = vmatprep.subr.bf16.mxu1 %v4477_v5  ;;  %1206 = vmatprep.subr.bf16.mxu0 %v4479_v6  ;;  %v4485_v10 = vld [vmem:[#allocation7 + $0xc] ss:$28 sps:$4 sm:$0xff]   ;;  %v845_v11 = vpack.c.bf16 %v844_v9, %v844_v9  ;;  %v846_v12 = vld [vmem:[%s731_s28] sm:$0xff]  ;;  %v4488_v15 = vld [vmem:[#allocation7 + $0x44] ss:$28 sps:$4 sm:$0xff]   ;;  %s6277_s7 = sld [smem:[#allocation41_spill]] }
 0x197   : > { %v4483_v13 = vld [vmem:[#allocation7 + $0x8] ss:$28 sps:$4 sm:$0xff]   ;;  %v5944_v14 = vpack.c.bf16 %v846_v12, %v846_v12  ;;  %v4486_v16 = vld [vmem:[#allocation7 + $0x40] ss:$28 sps:$4 sm:$0xff]   ;;  %v4491_v17 = vld [vmem:[#allocation7 + $0x14] ss:$28 sps:$4 sm:$0xff]  }
 0x198   : > { %v4489_v18 = vld [vmem:[#allocation7 + $0x10] ss:$28 sps:$4 sm:$0xff]   ;;  %v4499_v19 = vld [vmem:[#allocation11] ss:$8 sps:$4 sm:$0xff]   ;;  %v4504_v22 = vld [vmem:[#allocation11 + $0x14] ss:$8 sps:$4 sm:$0xff]  }
 0x199   : > { %980 = vmatpush1.bf16.msra.mxu1 %v4481_v7  ;;  %1207 = vmatpush1.bf16.msra.mxu0 %v4482_v8  ;;  %v4501_v20 = vld [vmem:[#allocation11 + $0x4] ss:$8 sps:$4 sm:$0xff]   ;;  %v4502_v23 = vld [vmem:[#allocation11 + $0x10] ss:$8 sps:$4 sm:$0xff]   ;;  %v4505_v26 = vld [vmem:[#allocation11 + $0x20] ss:$8 sps:$4 sm:$0xff]  }
 0x19a   : > { %1018 = vmatprep.subr.bf16.mxu1 %v4485_v10  ;;  %v4494_v21 = vld [vmem:[#allocation7 + $0x4c] ss:$28 sps:$4 sm:$0xff]   ;;  %1633 = vmatprep.subr.bf16.mxu0 %v4501_v20  ;;  %v4495_v27 = vld [vmem:[#allocation7 + $0x18] ss:$28 sps:$4 sm:$0xff]   ;;  %v4498_v36 = vld [vmem:[#allocation8 + $0x20] ss:$12 sps:$4 sm:$0xff]  }
 0x19b   : > { %v4492_v24 = vld [vmem:[#allocation7 + $0x48] ss:$28 sps:$4 sm:$0xff]   ;;  %v4510_v29 = vld [vmem:[#allocation11 + $0x34] ss:$8 sps:$4 sm:$0xff]   ;;  %v4508_v30 = vld [vmem:[#allocation11 + $0x30] ss:$8 sps:$4 sm:$0xff]  }
 0x19c   : > { %3916 = vmatmul.mubr.msk.bf16.vlgmr.msra.gmra.mrb[0].mxu1 %vm973_vm0, %v845_v11  ;;  %3926 = vmatmul.mubr.msk.bf16.vlgmr.msra.gmra.mrb[0].mxu0 %vm973_vm0, %v5944_v14  ;;  %v4507_v25 = vld [vmem:[#allocation11 + $0x24] ss:$8 sps:$4 sm:$0xff]   ;;  %v4511_v33 = vld [vmem:[#allocation11 + $0x40] ss:$8 sps:$4 sm:$0xff]   ;;  %v4516_v35 = vld [vmem:[#allocation11 + $0x54] ss:$8 sps:$4 sm:$0xff]  }
 0x19d   : > { %1019 = vmatpush1.bf16.msra.mxu1 %v4483_v13  ;;  %1050 = vmatprep.mubr.bf16.mxu1 %v5399_v0  ;;  %v4496_v31 = vld [vmem:[#allocation7 + $0x50] ss:$28 sps:$4 sm:$0xff]   ;;  %v4497_v34 = vld [vmem:[#allocation8 + $0x8] ss:$12 sps:$4 sm:$0xff]   ;;  %v4517_v39 = vld [vmem:[#allocation11 + $0x60] ss:$8 sps:$4 sm:$0xff]   ;;  %v866_v13 = vlaneseq }
 0x19e   : > { %1020 = vmatprep.subr.bf16.mxu1 %v4488_v15  ;;  %1634 = vmatpush1.bf16.msra.mxu0 %v4499_v19  ;;  %v4513_v32 = vld [vmem:[#allocation11 + $0x44] ss:$8 sps:$4 sm:$0xff]   ;;  %v4514_v37 = vld [vmem:[#allocation11 + $0x50] ss:$8 sps:$4 sm:$0xff]   ;;  %v4522_v40 = vld [vmem:[#allocation11 + $0x74] ss:$8 sps:$4 sm:$0xff]  }
 0x19f   : > { %1635 = vmatprep.subr.bf16.mxu0 %v4504_v22  ;;  %v4519_v38 = vld [vmem:[#allocation11 + $0x64] ss:$8 sps:$4 sm:$0xff]   ;;  %v4520_v41 = vld [vmem:[#allocation11 + $0x70] ss:$8 sps:$4 sm:$0xff]   ;;  %v4523_v43 = vld [vmem:[#allocation11 + $0x80] ss:$8 sps:$4 sm:$0xff]  }
 0x1a0   : > { %v4525_v42 = vld [vmem:[#allocation11 + $0x84] ss:$8 sps:$4 sm:$0xff]   ;;  %v4528_v44 = vld [vmem:[#allocation11 + $0x94] ss:$8 sps:$4 sm:$0xff]   ;;  %v4526_v45 = vld [vmem:[#allocation11 + $0x90] ss:$8 sps:$4 sm:$0xff]  }
 0x1a1   : > { %1021 = vmatpush1.bf16.msra.mxu1 %v4486_v16  ;;  %v4531_v46 = vld [vmem:[#allocation11 + $0xa4] ss:$8 sps:$4 sm:$0xff]   ;;  %v4529_v47 = vld [vmem:[#allocation11 + $0xa0] ss:$8 sps:$4 sm:$0xff]   ;;  %v4534_v48 = vld [vmem:[#allocation11 + $0xb4] ss:$8 sps:$4 sm:$0xff]  }
 0x1a2   : > { %1059 = vmatprep.subr.bf16.mxu1 %v4491_v17  ;;  %1636 = vmatpush1.bf16.msra.mxu0 %v4502_v23  ;;  %v4532_v49 = vld [vmem:[#allocation11 + $0xb0] ss:$8 sps:$4 sm:$0xff]   ;;  %v4537_v50 = vld [vmem:[#allocation11 + $0xc4] ss:$8 sps:$4 sm:$0xff]   ;;  %v4535_v51 = vld [vmem:[#allocation11 + $0xc0] ss:$8 sps:$4 sm:$0xff]  }
 0x1a3   : > { %1637 = vmatprep.subr.bf16.mxu0 %v4507_v25  ;;  %v4540_v52 = vld [vmem:[#allocation11 + $0xd4] ss:$8 sps:$4 sm:$0xff]   ;;  %v4538_v53 = vld [vmem:[#allocation11 + $0xd0] ss:$8 sps:$4 sm:$0xff]   ;;  %v4543_v54 = vld [vmem:[#allocation11 + $0xe4] ss:$8 sps:$4 sm:$0xff]  }
 0x1a4   : > { %3917 = vmatmul.mubr.msk.bf16.vlgmr.msra.gmra.mrb[4].mxu1 %vm973_vm0, %v845_v11  ;;  %v4541_v55 = vld [vmem:[#allocation11 + $0xe0] ss:$8 sps:$4 sm:$0xff]   ;;  %v4546_v56 = vld [vmem:[#allocation11 + $0xf4] ss:$8 sps:$4 sm:$0xff]   ;;  %v4544_v57 = vld [vmem:[#allocation11 + $0xf0] ss:$8 sps:$4 sm:$0xff]  }
 0x1a5   : > { %1060 = vmatpush1.bf16.msra.mxu1 %v4489_v18  ;;  %1091 = vmatprep.mubr.bf16.mxu1 %v5399_v0  ;;  %v4549_v58 = vld [vmem:[#allocation11 + $0x104] ss:$8 sps:$4 sm:$0xff]   ;;  %v4547_v59 = vld [vmem:[#allocation11 + $0x100] ss:$8 sps:$4 sm:$0xff]   ;;  %v4555_v61 = vld [vmem:[#allocation11 + $0x114] ss:$8 sps:$4 sm:$0xff]  }
 0x1a6   : > { %1061 = vmatprep.subr.bf16.mxu1 %v4494_v21  ;;  %1638 = vmatpush1.bf16.msra.mxu0 %v4505_v26  ;;  %v4552_v60 = vld [vmem:[#allocation10 + $0x104] ss:$8 sps:$4 sm:$0xff]   ;;  %v4553_v62 = vld [vmem:[#allocation11 + $0x110] ss:$8 sps:$4 sm:$0xff]   ;;  %v4559_v1 = vld [vmem:[#allocation11 + $0x120] ss:$8 sps:$4 sm:$0xff]  }
 0x1a7   : > { %1639 = vmatprep.subr.bf16.mxu0 %v4510_v29  ;;  %v4561_v63 = vld [vmem:[#allocation11 + $0x124] ss:$8 sps:$4 sm:$0xff]   ;;  %v4567_v2 = vld [vmem:[#allocation11 + $0x134] ss:$8 sps:$4 sm:$0xff]   ;;  %v4565_v3 = vld [vmem:[#allocation11 + $0x130] ss:$8 sps:$4 sm:$0xff]  }
 0x1a8   : > { %v4573_v4 = vld [vmem:[#allocation11 + $0x144] ss:$8 sps:$4 sm:$0xff]   ;;  %v4571_v5 = vld [vmem:[#allocation11 + $0x140] ss:$8 sps:$4 sm:$0xff]   ;;  %v4579_v6 = vld [vmem:[#allocation11 + $0x154] ss:$8 sps:$4 sm:$0xff]  }
 0x1a9   : > { %1062 = vmatpush1.bf16.msra.mxu1 %v4492_v24  ;;  %v4577_v7 = vld [vmem:[#allocation11 + $0x150] ss:$8 sps:$4 sm:$0xff]   ;;  %v4585_v8 = vld [vmem:[#allocation11 + $0x164] ss:$8 sps:$4 sm:$0xff]   ;;  %v4583_v9 = vld [vmem:[#allocation11 + $0x160] ss:$8 sps:$4 sm:$0xff]  }
 0x1aa   : > { %4279 = vmatprep.subr.bf16.mxu1 %v5400_v28  ;;  %1640 = vmatpush1.bf16.msra.mxu0 %v4508_v30  ;;  %v4591_v10 = vld [vmem:[#allocation11 + $0x174] ss:$8 sps:$4 sm:$0xff]   ;;  %v4597_v12 = vld [vmem:[#allocation10 + $0x4] ss:$8 sps:$4 sm:$0xff]   ;;  %v5973_v17 = vld [vmem:[%s6277_s7] sm:$0x7] }
 0x1ab   : > { %1641 = vmatprep.subr.bf16.mxu0 %v4513_v32  ;;  %v5968_v16 = vld [vmem:[%s6276_s30] sm:$0xff]  ;;  %s4295_s13 = smul.u32 24, %s5895_s19  ;;  %s6278_s12 = sld [smem:[#allocation44_spill]] }
 0x1ac   : > { %3918 = vmatmul.mubr.msk.bf16.vlgmr.msra.gmra.mrb[8].mxu1 %vm973_vm0, %v845_v11  ;;  %s6279_s28 = sld [smem:[#allocation48_spill]]  ;;  %s6280_s30 = sld [smem:[#allocation50_spill]] }
 0x1ad   : > { %4280 = vmatpush3.bf16.msra.mxu1 %v4495_v27  ;;  %4283 = vmatprep.mubr.msk.bf16.mxu1 %vm5401_vm1, %v5400_v28  ;;  %s5994_s14 = scalar_lea.vmem [#allocation22], %s4295_s13  ;;  %s5998_s20 = scalar_lea.vmem [#allocation23], %s4295_s13 }
 0x1ae   : > { %4281 = vmatprep.subr.bf16.mxu1 %v5400_v28  ;;  %1642 = vmatpush1.bf16.msra.mxu0 %v4511_v33  ;;  %s4296_s18 = smul.u32 384, %s5531_s3  ;;  %s3609_s6 = sshll.u32 %s5998_s20, 4  ;;  %s3610_s6 = int_to_ptr.vmem [resolvable:$true] %s3609_s6 }
 0x1af   : > { %1643 = vmatprep.subr.bf16.mxu0 %v4516_v35  ;;  %s6281_s5 = sld [smem:[#allocation53_spill]]  ;;  %s5223_s21 = scalar_lea.vmem %s3610_s6, 384 }
 0x1b0   : > { %p5224_p3 = scmp.ne.s32.totalorder %s3610_s6, %s5223_s21  ;;  %p6282_p6 = scmp.ne.s32.totalorder %s6257_s27, 0 }
 0x1b1   : > { %4282 = vmatpush3.bf16.msra.mxu1 %v4496_v31  ;;  %s5402_s2 = smov [#allocation23]  }
 0x1b2   : > { %4287 = vmatprep.subr.bf16.mxu1 %v5400_v28  ;;  %1644 = vmatpush1.bf16.msra.mxu0 %v4514_v37  ;;  %p5225_p4 = pnand %p5224_p3, %p6282_p6 }
 0x1b3   : > { %1645 = vmatprep.subr.bf16.mxu0 %v4519_v38  ;;  %v4550_v38 = vld [vmem:[#allocation10 + $0x100] ss:$8 sps:$4 sm:$0xff]  }
 0x1b4   : > { %4284 = vmatmul.mubr.msk.bf16.vlgmr.msra.gmra.mrb[12].mxu1 %vm973_vm0, %v845_v11  ;;  %v4589_v11 = vld [vmem:[#allocation11 + $0x170] ss:$8 sps:$4 sm:$0xff]   ;;  %p5226_p8 = pneg %p5225_p4 }
 0x1b5   : > { %4288 = vmatpush3.bf16.msra.mxu1 %v4497_v34  ;;  %4291 = vmatprep.mubr.msk.bf16.mxu1 %vm5401_vm1, %v5400_v28  ;;  %s6072_s15 = scalar_lea.hbm %s6281_s5, %s4296_s18 }
 0x1b6   : > { %4289 = vmatprep.subr.bf16.mxu1 %v5400_v28  ;;  %1646 = vmatpush1.bf16.msra.mxu0 %v4517_v39 }
 0x1b7   : > { %1647 = vmatprep.subr.bf16.mxu0 %v4522_v40  ;;  %v4558_v40 = vld [vmem:[#allocation10 + $0x114] ss:$8 sps:$4 sm:$0xff]  }
 0x1b9   : > { %4290 = vmatpush3.bf16.msra.mxu1 %v4498_v36 }
 0x1ba   : > { %1648 = vmatpush1.bf16.msra.mxu0 %v4520_v41  ;;  %1674 = vmatprep.subr.bf16.mxu1 %v4549_v58  ;;  %v4580_v58 = vld [vmem:[#allocation10 + $0x150] ss:$8 sps:$4 sm:$0xff]  }
 0x1bb   : > { %1649 = vmatprep.subr.bf16.mxu0 %v4525_v42  ;;  %v4556_v42 = vld [vmem:[#allocation10 + $0x110] ss:$8 sps:$4 sm:$0xff]  }
 0x1bc   : > { %4292 = vmatmul.mubr.msk.bf16.vlgmr.msra.gmra.mrb[16].mxu1 %vm973_vm0, %v5944_v14  ;;  %v5960_v14 = vshrl.u32 %v866_v13, 7 }
 0x1bd   : > { %1706 = vmatprep.mubr.bf16.mxu1 %v5399_v0  ;;  %1675 = vmatpush1.bf16.msra.mxu1 %v4547_v59 }
 0x1be   : > { %1650 = vmatpush1.bf16.msra.mxu0 %v4523_v43  ;;  %1676 = vmatprep.subr.bf16.mxu1 %v4555_v61  ;;  %v5963_v15 = vsub.s32 0, %v5960_v14  ;;  %v5976_v18 = vsub.s32 1, %v5960_v14  ;;  %v5990_v29 = vsub.s32 2, %v5960_v14 }
 0x1bf   : > { %1651 = vmatprep.subr.bf16.mxu0 %v4528_v44 }
 0x1c0   : > { %v869_v19 = vrot.slane %v5968_v16, %v5963_v15  ;;  %v1157_v20 = vrot.slane %v5973_v17, %v5963_v15  ;;  %v873_v21 = vrot.slane %v5968_v16, %v5976_v18  ;;  %v1161_v22 = vrot.slane %v5973_v17, %v5976_v18 }
 0x1c1   : > { %1677 = vmatpush1.bf16.msra.mxu1 %v4553_v62  ;;  %v877_v39 = vrot.slane %v5968_v16, %v5990_v29 }
 0x1c2   : > { %1652 = vmatpush1.bf16.msra.mxu0 %v4526_v45  ;;  %1678 = vmatprep.subr.bf16.mxu1 %v4561_v63  ;;  %v4564_v45 = vld [vmem:[#allocation10 + $0x124] ss:$8 sps:$4 sm:$0xff]   ;;  %v4586_v63 = vld [vmem:[#allocation10 + $0x160] ss:$8 sps:$4 sm:$0xff]  }
 0x1c3   : > { %1653 = vmatprep.subr.bf16.mxu0 %v4531_v46 }
 0x1c5   : > { %1679 = vmatpush1.bf16.msra.mxu1 %v4559_v1  ;;  %v1165_v1 = vrot.slane %v5973_v17, %v5990_v29  ;;  %v4598_v17 = vld [vmem:[#allocation10 + $0x10] ss:$8 sps:$4 sm:$0xff]  }
 0x1c6   : > { %1654 = vmatpush1.bf16.msra.mxu0 %v4529_v47  ;;  %1680 = vmatprep.subr.bf16.mxu1 %v4567_v2  ;;  %v4594_v2 = vld [vmem:[#allocation10 + $0x174] ss:$8 sps:$4 sm:$0xff]  }
 0x1c7   : > { %1655 = vmatprep.subr.bf16.mxu0 %v4534_v48  ;;  %v4562_v48 = vld [vmem:[#allocation10 + $0x120] ss:$8 sps:$4 sm:$0xff]  }
 0x1c9   : > { %1681 = vmatpush1.bf16.msra.mxu1 %v4565_v3 }
 0x1ca   : > { %1656 = vmatpush1.bf16.msra.mxu0 %v4532_v49  ;;  %1682 = vmatprep.subr.bf16.mxu1 %v4573_v4  ;;  %v4570_v49 = vld [vmem:[#allocation10 + $0x134] ss:$8 sps:$4 sm:$0xff]   ;;  %v4592_v4 = vld [vmem:[#allocation10 + $0x170] ss:$8 sps:$4 sm:$0xff]  }
 0x1cb   : > { %1657 = vmatprep.subr.bf16.mxu0 %v4537_v50 }
 0x1cd   : > { %1683 = vmatpush1.bf16.msra.mxu1 %v4571_v5 }
 0x1ce   : > { %1658 = vmatpush1.bf16.msra.mxu0 %v4535_v51  ;;  %1684 = vmatprep.subr.bf16.mxu1 %v4579_v6  ;;  %v4568_v51 = vld [vmem:[#allocation10 + $0x130] ss:$8 sps:$4 sm:$0xff]  }
 0x1cf   : > { %1659 = vmatprep.subr.bf16.mxu0 %v4540_v52 }
 0x1d1   : > { %1685 = vmatpush1.bf16.msra.mxu1 %v4577_v7 }
 0x1d2   : > { %1660 = vmatpush1.bf16.msra.mxu0 %v4538_v53  ;;  %1686 = vmatprep.subr.bf16.mxu1 %v4585_v8  ;;  %v4595_v8 = vld [vmem:[#allocation10] ss:$8 sps:$4 sm:$0xff]  }
 0x1d3   : > { %1661 = vmatprep.subr.bf16.mxu0 %v4543_v54 }
 0x1d5   : > { %1687 = vmatpush1.bf16.msra.mxu1 %v4583_v9 }
 0x1d6   : > { %1662 = vmatpush1.bf16.msra.mxu0 %v4541_v55  ;;  %1688 = vmatprep.subr.bf16.mxu1 %v4591_v10  ;;  %v4574_v55 = vld [vmem:[#allocation10 + $0x140] ss:$8 sps:$4 sm:$0xff]  }
 0x1d7   : > { %1663 = vmatprep.subr.bf16.mxu0 %v4546_v56  ;;  %v4582_v56 = vld [vmem:[#allocation10 + $0x154] ss:$8 sps:$4 sm:$0xff]  }
 0x1d9   : > { %1689 = vmatpush1.bf16.msra.mxu1 %v4589_v11  ;;  %v4600_v11 = vld [vmem:[#allocation10 + $0x14] ss:$8 sps:$4 sm:$0xff]  }
 0x1da   : > { %1664 = vmatpush1.bf16.msra.mxu0 %v4544_v57  ;;  %1955 = vmatprep.subr.bf16.mxu1 %v4597_v12 }
 0x1db   : > { %1996 = vmatprep.subr.bf16.mxu0 %v4552_v60  ;;  %v4588_v60 = vld [vmem:[#allocation10 + $0x164] ss:$8 sps:$4 sm:$0xff]  }
 0x26f   : > { %v1011_v23 = vpop.f32.mrb[0].mxu1  ;;  %v1238_v24 = vpop.f32.mrb[0].mxu0 }
 0x270   : > { %v5987_v25 = vadd.f32 %v1011_v23, %v869_v19  ;;  %v1239_v26 = vadd.f32 %v1238_v24, %v1157_v20  ;;  %v1013_v27 = vpop.f32.mrb[1].mxu1  ;;  %v1240_v28 = vpop.f32.mrb[1].mxu0  ;;  %v4603_v20 = vld [vmem:[#allocation10 + $0x24] ss:$8 sps:$4 sm:$0xff]   ;;  %v4604_v23 = vld [vmem:[#allocation10 + $0x30] ss:$8 sps:$4 sm:$0xff]  }
 0x271   : > { %v5992_v30 = vadd.f32 %v1013_v27, %v873_v21  ;;  %v1241_v31 = vadd.f32 %v1240_v28, %v1161_v22  ;;  %v1015_v32 = vpop.f32.mrb[2].mxu1  ;;  %v1242_v33 = vpop.f32.mrb[2].mxu0  ;;  %v4601_v21 = vld [vmem:[#allocation10 + $0x20] ss:$8 sps:$4 sm:$0xff]   ;;  %v4606_v22 = vld [vmem:[#allocation10 + $0x34] ss:$8 sps:$4 sm:$0xff]  }
 0x272   : > { %1285 = vst [vmem:[%s5994_s14] sm:$0xff] %v5987_v25  ;;  %1288 = vst [vmem:[%s5998_s20] sm:$0xff] %v1239_v26  ;;  %v1342_v34 = vpack.c.bf16 %v1239_v26, %v1239_v26  ;;  %v1016_v35 = vpop.f32.mrb[3].mxu1  ;;  %v1243_v36 = vpop.f32.mrb[3].mxu0  ;;  %v4609_v24 = vld [vmem:[#allocation10 + $0x44] ss:$8 sps:$4 sm:$0xff]   ;;  %v4607_v26 = vld [vmem:[#allocation10 + $0x40] ss:$8 sps:$4 sm:$0xff]  }
 0x273   : > { %1286 = vst [vmem:[%s5994_s14 + $0x8] sm:$0xff] %v5992_v30  ;;  %1289 = vst [vmem:[%s5998_s20 + $0x8] sm:$0xff] %v1241_v31  ;;  %v1343_v37 = vpack.c.bf16 %v1241_v31, %v1241_v31  ;;  %v1292_v12 = vpack.c.bf16 %v5992_v30, %v5992_v30  ;;  %v4612_v27 = vld [vmem:[#allocation10 + $0x54] ss:$8 sps:$4 sm:$0xff]   ;;  %v4610_v28 = vld [vmem:[#allocation10 + $0x50] ss:$8 sps:$4 sm:$0xff]  }
 0x274   : > { %v4615_v30 = vld [vmem:[#allocation10 + $0x64] ss:$8 sps:$4 sm:$0xff]   ;;  %v4613_v31 = vld [vmem:[#allocation10 + $0x60] ss:$8 sps:$4 sm:$0xff]   ;;  %v4618_v32 = vld [vmem:[#allocation10 + $0x74] ss:$8 sps:$4 sm:$0xff]  }
 0x275   : > { %1665 = vmatprep.mubr.bf16.mxu0 %v1343_v37  ;;  %v4616_v33 = vld [vmem:[#allocation10 + $0x70] ss:$8 sps:$4 sm:$0xff]   ;;  %v4619_v35 = vld [vmem:[#allocation10 + $0x80] ss:$8 sps:$4 sm:$0xff]   ;;  %v4624_v36 = vld [vmem:[#allocation10 + $0x94] ss:$8 sps:$4 sm:$0xff]  }
 0x276   : > { %1666 = vmatmul.mubr.bf16.vlgmr.msra.gmra.mrb[4].mxu0 %v1342_v34  ;;  %v4621_v34 = vld [vmem:[#allocation10 + $0x84] ss:$8 sps:$4 sm:$0xff]   ;;  %v4622_v37 = vld [vmem:[#allocation10 + $0x90] ss:$8 sps:$4 sm:$0xff]  }
 0x277   : > { %1997 = vmatpush1.bf16.msra.mxu0 %v4550_v38  ;;  %v1052_v41 = vpop.f32.mrb[4].mxu1  ;;  %2028 = vmatprep.mubr.bf16.mxu0 %v5399_v0  ;;  %v4576_v0 = vld [vmem:[#allocation10 + $0x144] ss:$8 sps:$4 sm:$0xff]  }
 0x278   : > { %v1053_v43 = vadd.f32 %v1052_v41, %v877_v39  ;;  %v6007_v44 = vpop.f32.mrb[5].mxu1  ;;  %1998 = vmatprep.subr.bf16.mxu0 %v4558_v40  ;;  %v4627_v38 = vld [vmem:[#allocation10 + $0xa4] ss:$8 sps:$4 sm:$0xff]   ;;  %v4625_v39 = vld [vmem:[#allocation10 + $0xa0] ss:$8 sps:$4 sm:$0xff]  }
 0x279   : > { %v1056_v46 = vpop.f32.mrb[6].mxu1  ;;  %v4630_v40 = vld [vmem:[#allocation10 + $0xb4] ss:$8 sps:$4 sm:$0xff]   ;;  %v4628_v41 = vld [vmem:[#allocation10 + $0xb0] ss:$8 sps:$4 sm:$0xff]  }
 0x27a   : > { %1287 = vst [vmem:[%s5994_s14 + $0x10] sm:$0xff] %v1053_v43  ;;  %v1057_v47 = vpop.f32.mrb[7].mxu1  ;;  %v1293_v19 = vpack.c.bf16 %v1053_v43, %v1053_v43  ;;  %v4631_v43 = vld [vmem:[#allocation10 + $0xc0] ss:$8 sps:$4 sm:$0xff]   ;;  %v884_v46 = vsub.s32 4, %v5960_v14 }
 0x27b   : > { %1999 = vmatpush1.bf16.msra.mxu0 %v4556_v42  ;;  %v4633_v42 = vld [vmem:[#allocation10 + $0xc4] ss:$8 sps:$4 sm:$0xff]   ;;  %v4634_v47 = vld [vmem:[#allocation10 + $0xd0] ss:$8 sps:$4 sm:$0xff]  }
 0x27c   : > { %2000 = vmatprep.subr.bf16.mxu0 %v4564_v45  ;;  %v4636_v45 = vld [vmem:[#allocation10 + $0xd4] ss:$8 sps:$4 sm:$0xff]  }
 0x27f   : > { %2001 = vmatpush1.bf16.msra.mxu0 %v4562_v48  ;;  %v6010_v50 = vpop.f32.mrb[8].mxu1  ;;  %v4639_v48 = vld [vmem:[#allocation10 + $0xe4] ss:$8 sps:$4 sm:$0xff]  }
 0x280   : > { %v6012_v52 = vpop.f32.mrb[9].mxu1  ;;  %2002 = vmatprep.subr.bf16.mxu0 %v4570_v49  ;;  %v885_v49 = vrot.slane %v5968_v16, %v884_v46  ;;  %v4688_v46 = vld [vmem:[#allocation14 + $0xf0] ss:$8 sps:$4 sm:$0xff]  }
 0x281   : > { %v1097_v53 = vpop.f32.mrb[10].mxu1 }
 0x282   : > { %v1098_v54 = vpop.f32.mrb[11].mxu1  ;;  %v1094_v53 = vadd.f32 %v6010_v50, %v885_v49  ;;  %v4649_v50 = vld [vmem:[#allocation14 + $0x20] ss:$8 sps:$4 sm:$0xff]  }
 0x283   : > { %2003 = vmatpush1.bf16.msra.mxu0 %v4568_v51  ;;  %v4637_v51 = vld [vmem:[#allocation10 + $0xe0] ss:$8 sps:$4 sm:$0xff]   ;;  %v4640_v54 = vld [vmem:[#allocation10 + $0xf0] ss:$8 sps:$4 sm:$0xff]  }
 0x284   : > { %2004 = vmatprep.subr.bf16.mxu0 %v4576_v0  ;;  %v4642_v0 = vld [vmem:[#allocation10 + $0xf4] ss:$8 sps:$4 sm:$0xff]   ;;  %v4701_v49 = vld [vmem:[#allocation13 + $0x68] sm:$0xff]  }
 0x287   : > { %2005 = vmatpush1.bf16.msra.mxu0 %v4574_v55  ;;  %v6014_v57 = vpop.f32.mrb[12].mxu1  ;;  %v4645_v55 = vld [vmem:[#allocation14 + $0x4] ss:$8 sps:$4 sm:$0xff]  }
 0x288   : > { %v4285_v59 = vpop.f32.mrb[13].mxu1  ;;  %2006 = vmatprep.subr.bf16.mxu0 %v4582_v56  ;;  %v1141_v56 = vmax.f32 %v1094_v53, 0.0  ;;  %v4704_v53 = vld [vmem:[#allocation13 + $0x30] sm:$0xff]  }
 0x289   : > { %v1137_v61 = vpop.f32.mrb[14].mxu1  ;;  %v1291_v59 = vpack.c.bf16 %v5987_v25, %v5987_v25  ;;  %v4660_v25 = vld [vmem:[#allocation14 + $0x54] ss:$8 sps:$4 sm:$0xff]  }
 0x28a   : > { %v4286_v62 = vpop.f32.mrb[15].mxu1  ;;  %v2231_v61 = vpack.c.bf16 %v1141_v56, %v1141_v56 }
 0x28b   : > { %2007 = vmatpush1.bf16.msra.mxu0 %v4580_v58  ;;  %v4643_v58 = vld [vmem:[#allocation14] ss:$8 sps:$4 sm:$0xff]   ;;  %v4646_v62 = vld [vmem:[#allocation14 + $0x10] ss:$8 sps:$4 sm:$0xff]  }
 0x28c   : > { %2008 = vmatprep.subr.bf16.mxu0 %v4588_v60  ;;  %v4648_v60 = vld [vmem:[#allocation14 + $0x14] ss:$8 sps:$4 sm:$0xff]  }
 0x28f   : > { %2009 = vmatpush1.bf16.msra.mxu0 %v4586_v63  ;;  %v1279_v3 = vpop.f32.mrb[16].mxu1  ;;  %v4651_v63 = vld [vmem:[#allocation14 + $0x24] ss:$8 sps:$4 sm:$0xff]  }
 0x290   : > { %v1280_v5 = vadd.f32 %v1279_v3, %v1165_v1  ;;  %v4293_v6 = vpop.f32.mrb[17].mxu1  ;;  %2010 = vmatprep.subr.bf16.mxu0 %v4594_v2  ;;  %v4654_v1 = vld [vmem:[#allocation14 + $0x34] ss:$8 sps:$4 sm:$0xff]   ;;  %v4652_v2 = vld [vmem:[#allocation14 + $0x30] ss:$8 sps:$4 sm:$0xff]  }
 0x291   : > { %v1282_v7 = vpop.f32.mrb[18].mxu1  ;;  %v4657_v3 = vld [vmem:[#allocation14 + $0x44] ss:$8 sps:$4 sm:$0xff]  }
 0x292   : > { %1290 = vst [vmem:[%s5998_s20 + $0x10] sm:$0xff] %v1280_v5  ;;  %v1344_v9 = vpack.c.bf16 %v1280_v5, %v1280_v5  ;;  %v4294_v10 = vpop.f32.mrb[19].mxu1  ;;  %v4658_v5 = vld [vmem:[#allocation14 + $0x50] ss:$8 sps:$4 sm:$0xff]   ;;  %v4663_v6 = vld [vmem:[#allocation14 + $0x64] ss:$8 sps:$4 sm:$0xff]  }
 0x293   : > { %2011 = vmatpush1.bf16.msra.mxu0 %v4592_v4  ;;  %v4655_v4 = vld [vmem:[#allocation14 + $0x40] ss:$8 sps:$4 sm:$0xff]  }
 0x294   : > { %1707 = vmatmul.mubr.bf16.vlgmr.msra.gmra.mrb[20].mxu1 %v1344_v9  ;;  %v4661_v7 = vld [vmem:[#allocation14 + $0x60] ss:$8 sps:$4 sm:$0xff]  }
 0x295   : > { %1956 = vmatpush1.bf16.msra.mxu1 %v4595_v8  ;;  %1987 = vmatprep.mubr.bf16.mxu1 %v1292_v12  ;;  %v4666_v8 = vld [vmem:[#allocation14 + $0x74] ss:$8 sps:$4 sm:$0xff]   ;;  %v4691_v9 = vld [vmem:[#allocation13 + $0x40] sm:$0xff]   ;;  %v4664_v12 = vld [vmem:[#allocation14 + $0x70] ss:$8 sps:$4 sm:$0xff]  }
 0x296   : > { %2029 = vmatmul.mubr.bf16.vlgmr.msra.gmra.mrb[8].mxu0 %v1293_v19  ;;  %1957 = vmatprep.subr.bf16.mxu1 %v4600_v11  ;;  %v4692_v10 = vld [vmem:[#allocation13] sm:$0xff]   ;;  %v4693_v11 = vld [vmem:[#allocation13 + $0x48] sm:$0xff]  }
 0x297   : > { %v4669_v19 = vld [vmem:[#allocation14 + $0x84] ss:$8 sps:$4 sm:$0xff]   ;;  %4213 = vmatprep.subr.bf16.mxu0 %v4691_v9 }
 0x298   : > { %4214 = vmatpush3.bf16.msra.mxu0 %v4692_v10 }
 0x299   : > { %1958 = vmatpush1.bf16.msra.mxu1 %v4598_v17  ;;  %v4694_v17 = vld [vmem:[#allocation13 + $0x8] sm:$0xff]   ;;  %4215 = vmatprep.subr.bf16.mxu0 %v4693_v11 }
 0x29a   : > { %1959 = vmatprep.subr.bf16.mxu1 %v4603_v20  ;;  %v4695_v20 = vld [vmem:[#allocation13 + $0x50] sm:$0xff]  }
 0x29c   : > { %4216 = vmatpush3.bf16.msra.mxu0 %v4694_v17 }
 0x29d   : > { %1960 = vmatpush1.bf16.msra.mxu1 %v4601_v21  ;;  %v4667_v21 = vld [vmem:[#allocation14 + $0x80] ss:$8 sps:$4 sm:$0xff]   ;;  %4217 = vmatprep.subr.bf16.mxu0 %v4695_v20 }
 0x29e   : > { %1961 = vmatprep.subr.bf16.mxu1 %v4606_v22  ;;  %v4672_v22 = vld [vmem:[#allocation14 + $0x94] ss:$8 sps:$4 sm:$0xff]  }
 0x2a1   : > { %1962 = vmatpush1.bf16.msra.mxu1 %v4604_v23  ;;  %v4696_v23 = vld [vmem:[#allocation13 + $0x10] sm:$0xff]  }
 0x2a2   : > { %1963 = vmatprep.subr.bf16.mxu1 %v4609_v24  ;;  %v4697_v24 = vld [vmem:[#allocation13 + $0x58] sm:$0xff]   ;;  %4218 = vmatpush3.bf16.msra.mxu0 %v4696_v23 }
 0x2a3   : > { %4219 = vmatprep.subr.bf16.mxu0 %v4697_v24 }
 0x2a5   : > { %1964 = vmatpush1.bf16.msra.mxu1 %v4607_v26  ;;  %v4670_v26 = vld [vmem:[#allocation14 + $0x90] ss:$8 sps:$4 sm:$0xff]  }
 0x2a6   : > { %1965 = vmatprep.subr.bf16.mxu1 %v4612_v27  ;;  %v4675_v27 = vld [vmem:[#allocation14 + $0xa4] ss:$8 sps:$4 sm:$0xff]  }
 0x2a9   : > { %1966 = vmatpush1.bf16.msra.mxu1 %v4610_v28  ;;  %v4698_v28 = vld [vmem:[#allocation13 + $0x18] sm:$0xff]  }
 0x2aa   : > { %1967 = vmatprep.subr.bf16.mxu1 %v4615_v30  ;;  %v4699_v30 = vld [vmem:[#allocation13 + $0x60] sm:$0xff]   ;;  %4220 = vmatpush3.bf16.msra.mxu0 %v4698_v28 }
 0x2ab   : > { %4221 = vmatprep.subr.bf16.mxu0 %v4699_v30 }
 0x2ad   : > { %1968 = vmatpush1.bf16.msra.mxu1 %v4613_v31  ;;  %v4673_v31 = vld [vmem:[#allocation14 + $0xa0] ss:$8 sps:$4 sm:$0xff]  }
 0x2ae   : > { %1969 = vmatprep.subr.bf16.mxu1 %v4618_v32  ;;  %v4678_v32 = vld [vmem:[#allocation14 + $0xb4] ss:$8 sps:$4 sm:$0xff]  }
 0x2b1   : > { %1970 = vmatpush1.bf16.msra.mxu1 %v4616_v33  ;;  %v4700_v33 = vld [vmem:[#allocation13 + $0x20] sm:$0xff]  }
 0x2b2   : > { %1971 = vmatprep.subr.bf16.mxu1 %v4621_v34  ;;  %v4676_v34 = vld [vmem:[#allocation14 + $0xb0] ss:$8 sps:$4 sm:$0xff]   ;;  %4222 = vmatpush3.bf16.msra.mxu0 %v4700_v33  ;;  %v4707_v33 = vld [vmem:[#allocation16] ss:$8 sps:$4 sm:$0xff]  }
 0x2b3   : > { %4223 = vmatprep.subr.bf16.mxu0 %v4701_v49  ;;  %v4728_v49 = vld [vmem:[#allocation16 + $0x70] ss:$8 sps:$4 sm:$0xff]  }
 0x2b5   : > { %1972 = vmatpush1.bf16.msra.mxu1 %v4619_v35  ;;  %v4681_v35 = vld [vmem:[#allocation14 + $0xc4] ss:$8 sps:$4 sm:$0xff]  }
 0x2b6   : > { %1973 = vmatprep.subr.bf16.mxu1 %v4624_v36  ;;  %v4679_v36 = vld [vmem:[#allocation14 + $0xc0] ss:$8 sps:$4 sm:$0xff]  }
 0x2b9   : > { %1974 = vmatpush1.bf16.msra.mxu1 %v4622_v37  ;;  %v880_v37 = vsub.s32 3, %v5960_v14 }
 0x2ba   : > { %1975 = vmatprep.subr.bf16.mxu1 %v4627_v38  ;;  %v4684_v38 = vld [vmem:[#allocation14 + $0xd4] ss:$8 sps:$4 sm:$0xff]  }
 0x2bd   : > { %1976 = vmatpush1.bf16.msra.mxu1 %v4625_v39  ;;  %v4682_v39 = vld [vmem:[#allocation14 + $0xd0] ss:$8 sps:$4 sm:$0xff]  }
 0x2be   : > { %1977 = vmatprep.subr.bf16.mxu1 %v4630_v40  ;;  %v881_v40 = vrot.slane %v5968_v16, %v880_v37  ;;  %v4710_v37 = vld [vmem:[#allocation16 + $0x10] ss:$8 sps:$4 sm:$0xff]  }
 0x2c1   : > { %1978 = vmatpush1.bf16.msra.mxu1 %v4628_v41  ;;  %v4687_v41 = vld [vmem:[#allocation14 + $0xe4] ss:$8 sps:$4 sm:$0xff]  }
 0x2c2   : > { %1979 = vmatprep.subr.bf16.mxu1 %v4633_v42  ;;  %v4685_v42 = vld [vmem:[#allocation14 + $0xe0] ss:$8 sps:$4 sm:$0xff]  }
 0x2c5   : > { %1980 = vmatpush1.bf16.msra.mxu1 %v4631_v43  ;;  %v1055_v43 = vadd.f32 %v6007_v44, %v881_v40  ;;  %v4709_v44 = vld [vmem:[#allocation16 + $0x4] ss:$8 sps:$4 sm:$0xff]   ;;  %v4716_v40 = vld [vmem:[#allocation16 + $0x30] ss:$8 sps:$4 sm:$0xff]  }
 0x2c6   : > { %1981 = vmatprep.subr.bf16.mxu1 %v4636_v45  ;;  %v4690_v45 = vld [vmem:[#allocation14 + $0xf4] ss:$8 sps:$4 sm:$0xff]  }
 0x2c9   : > { %1982 = vmatpush1.bf16.msra.mxu1 %v4634_v47  ;;  %v1140_v47 = vmax.f32 %v1055_v43, 0.0  ;;  %v4724_v43 = vld [vmem:[#allocation16 + $0x54] ss:$8 sps:$4 sm:$0xff]  }
 0x2ca   : > { %1983 = vmatprep.subr.bf16.mxu1 %v4639_v48 }
 0x2cb   : > { %v2230_v48 = vpack.c.bf16 %v1140_v47, %v1140_v47  ;;  %v4725_v47 = vld [vmem:[#allocation16 + $0x60] ss:$8 sps:$4 sm:$0xff]  }
 0x2cd   : > { %1984 = vmatpush1.bf16.msra.mxu1 %v4637_v51  ;;  %v4702_v51 = vld [vmem:[#allocation13 + $0x28] sm:$0xff]  }
 0x2ce   : > { %1985 = vmatprep.subr.bf16.mxu1 %v4642_v0  ;;  %4224 = vmatpush3.bf16.msra.mxu0 %v4702_v51  ;;  %v4703_v0 = vld [vmem:[#allocation13 + $0x70] sm:$0xff]   ;;  %v4733_v51 = vld [vmem:[#allocation16 + $0x84] ss:$8 sps:$4 sm:$0xff]  }
 0x2cf   : > { %4225 = vmatprep.subr.bf16.mxu0 %v4703_v0  ;;  %v4731_v0 = vld [vmem:[#allocation16 + $0x80] ss:$8 sps:$4 sm:$0xff]  }
 0x2d1   : > { %1986 = vmatpush1.bf16.msra.mxu1 %v4640_v54  ;;  %v4705_v54 = vld [vmem:[#allocation13 + $0x78] sm:$0xff]  }
 0x2d2   : > { %2436 = vmatprep.subr.bf16.mxu1 %v4645_v55  ;;  %4226 = vmatpush3.bf16.msra.mxu0 %v4704_v53  ;;  %v4706_v55 = vld [vmem:[#allocation13 + $0x38] sm:$0xff]  }
 0x2d3   : > { %4227 = vmatprep.subr.bf16.mxu0 %v4705_v54  ;;  %v4736_v53 = vld [vmem:[#allocation16 + $0x94] ss:$8 sps:$4 sm:$0xff]   ;;  %v4734_v54 = vld [vmem:[#allocation16 + $0x90] ss:$8 sps:$4 sm:$0xff]  }
 0x2d4   : > { %1988 = vmatmul.mubr.bf16.vlgmr.msra.gmra.mrb[24].mxu1 %v1291_v59 }
 0x2d5   : > { %2437 = vmatpush1.bf16.msra.mxu1 %v4643_v58  ;;  %2468 = vmatprep.mubr.bf16.mxu1 %v2231_v61 }
 0x2d6   : > { %2438 = vmatprep.subr.bf16.mxu1 %v4648_v60  ;;  %4228 = vmatpush3.bf16.msra.mxu0 %v4706_v55  ;;  %v4739_v55 = vld [vmem:[#allocation16 + $0xa4] ss:$8 sps:$4 sm:$0xff]  }
 0x2d7   : > { %2685 = vmatprep.subr.bf16.mxu0 %v4709_v44  ;;  %v4737_v44 = vld [vmem:[#allocation16 + $0xa0] ss:$8 sps:$4 sm:$0xff]  }
 0x2d9   : > { %2439 = vmatpush1.bf16.msra.mxu1 %v4646_v62 }
 0x2da   : > { %2440 = vmatprep.subr.bf16.mxu1 %v4651_v63 }
 0x2dd   : > { %2441 = vmatpush1.bf16.msra.mxu1 %v4649_v50 }
 0x2de   : > { %2442 = vmatprep.subr.bf16.mxu1 %v4654_v1 }
 0x2e1   : > { %2443 = vmatpush1.bf16.msra.mxu1 %v4652_v2 }
 0x2e2   : > { %2444 = vmatprep.subr.bf16.mxu1 %v4657_v3 }
 0x2e5   : > { %2445 = vmatpush1.bf16.msra.mxu1 %v4655_v4 }
 0x2e6   : > { %2446 = vmatprep.subr.bf16.mxu1 %v4660_v25 }
 0x2e9   : > { %2447 = vmatpush1.bf16.msra.mxu1 %v4658_v5 }
 0x2ea   : > { %2448 = vmatprep.subr.bf16.mxu1 %v4663_v6  ;;  %v892_v6 = vsub.s32 6, %v5960_v14 }
 0x2ed   : > { %2449 = vmatpush1.bf16.msra.mxu1 %v4661_v7  ;;  %v2037_v7 = vld [vmem:[%s6278_s12] sm:$0x3]  ;;  %s6076_s12 = scalar_lea.sflag [#allocation24], %s727_s26 }
 0x2ee   : > { %2450 = vmatprep.subr.bf16.mxu1 %v4666_v8  ;;  %v893_v8 = vrot.slane %v5968_v16, %v892_v6  ;;  %v2042_v11 = vrot.slane %v2037_v7, %v5963_v15  ;;  %v2046_v17 = vrot.slane %v2037_v7, %v5976_v18  ;;  %v4752_v7 = vld [vmem:[#allocation16 + $0xf0] ss:$8 sps:$4 sm:$0xff]  }
 0x2f0   : > { %v1135_v23 = vadd.f32 %v6014_v57, %v893_v8  ;;  %v4713_v57 = vld [vmem:[#allocation16 + $0x20] ss:$8 sps:$4 sm:$0xff]  }
 0x2f1   : > { %2451 = vmatpush1.bf16.msra.mxu1 %v4664_v12 }
 0x2f2   : > { %2452 = vmatprep.subr.bf16.mxu1 %v4669_v19  ;;  %v1143_v30 = vmax.f32 %v1135_v23, 0.0  ;;  %v4788_v23 = vld [vmem:[#allocation19 + $0x20] ss:$12 sps:$4 sm:$0xff]  }
 0x2f5   : > { %2453 = vmatpush1.bf16.msra.mxu1 %v4667_v21 }
 0x2f6   : > { %2454 = vmatprep.subr.bf16.mxu1 %v4672_v22 }
 0x2f9   : > { %2455 = vmatpush1.bf16.msra.mxu1 %v4670_v26 }
 0x2fa   : > { %2456 = vmatprep.subr.bf16.mxu1 %v4675_v27 }
 0x2fd   : > { %2457 = vmatpush1.bf16.msra.mxu1 %v4673_v31 }
 0x2fe   : > { %2458 = vmatprep.subr.bf16.mxu1 %v4678_v32 }
 0x301   : > { %2459 = vmatpush1.bf16.msra.mxu1 %v4676_v34 }
 0x302   : > { %2460 = vmatprep.subr.bf16.mxu1 %v4681_v35  ;;  %v4712_v35 = vld [vmem:[#allocation16 + $0x14] ss:$8 sps:$4 sm:$0xff]  }
 0x305   : > { %2461 = vmatpush1.bf16.msra.mxu1 %v4679_v36  ;;  %v2480_v36 = vpack.c.bf16 %v1143_v30, %v1143_v30  ;;  %v4797_v30 = vld [vmem:[#allocation19 + $0x110] ss:$12 sps:$4 sm:$0xff]  }
 0x306   : > { %2462 = vmatprep.subr.bf16.mxu1 %v4684_v38  ;;  %v4715_v38 = vld [vmem:[#allocation16 + $0x24] ss:$8 sps:$4 sm:$0xff]  }
 0x309   : > { %2463 = vmatpush1.bf16.msra.mxu1 %v4682_v39  ;;  %v4718_v39 = vld [vmem:[#allocation16 + $0x34] ss:$8 sps:$4 sm:$0xff]  }
 0x30a   : > { %2464 = vmatprep.subr.bf16.mxu1 %v4687_v41  ;;  %v4721_v41 = vld [vmem:[#allocation16 + $0x44] ss:$8 sps:$4 sm:$0xff]  }
 0x30d   : > { %2465 = vmatpush1.bf16.msra.mxu1 %v4685_v42  ;;  %v4719_v42 = vld [vmem:[#allocation16 + $0x40] ss:$8 sps:$4 sm:$0xff]  }
 0x30e   : > { %2466 = vmatprep.subr.bf16.mxu1 %v4690_v45  ;;  %v4722_v45 = vld [vmem:[#allocation16 + $0x50] ss:$8 sps:$4 sm:$0xff]  }
 0x311   : > { %2467 = vmatpush1.bf16.msra.mxu1 %v4688_v46  ;;  %v4727_v46 = vld [vmem:[#allocation16 + $0x64] ss:$8 sps:$4 sm:$0xff]  }
 0x314   : > { %2469 = vmatmul.mubr.bf16.vlgmr.msra.gmra.mrb[28].mxu1 %v2230_v48  ;;  %v4730_v48 = vld [vmem:[#allocation16 + $0x74] ss:$8 sps:$4 sm:$0xff]  }
 0x349   : > { %v1667_v56 = vpop.f32.mrb[4].mxu0 }
 0x34a   : > { %v1669_v58 = vpop.f32.mrb[5].mxu0 }
 0x34b   : > { %v1671_v59 = vpop.f32.mrb[6].mxu0 }
 0x34c   : > { %v1672_v60 = vpop.f32.mrb[7].mxu0  ;;  %v4745_v59 = vld [vmem:[#allocation16 + $0xc4] ss:$8 sps:$4 sm:$0xff]  }
 0x34d   : > { %v4743_v60 = vld [vmem:[#allocation16 + $0xc0] ss:$8 sps:$4 sm:$0xff]  }
 0x367   : > { %v1708_v61 = vpop.f32.mrb[20].mxu1 }
 0x368   : > { %v1709_v62 = vadd.f32 %v1708_v61, %v1667_v56  ;;  %v1710_v63 = vpop.f32.mrb[21].mxu1  ;;  %v4742_v56 = vld [vmem:[#allocation16 + $0xb4] ss:$8 sps:$4 sm:$0xff]   ;;  %v888_v61 = vsub.s32 5, %v5960_v14 }
 0x369   : > { %v1711_v50 = vadd.f32 %v1710_v63, %v1669_v58  ;;  %v2030_v1 = vpop.f32.mrb[8].mxu0  ;;  %v1712_v2 = vpop.f32.mrb[22].mxu1  ;;  %v4740_v58 = vld [vmem:[#allocation16 + $0xb0] ss:$8 sps:$4 sm:$0xff]   ;;  %v4754_v14 = vld [vmem:[#allocation16 + $0xf4] ss:$8 sps:$4 sm:$0xff]  }
 0x36a   : > { %v2032_v3 = vpop.f32.mrb[9].mxu0  ;;  %v1713_v4 = vpop.f32.mrb[23].mxu1  ;;  %v4746_v63 = vld [vmem:[#allocation16 + $0xd0] ss:$8 sps:$4 sm:$0xff]  }
 0x36b   : > { %v2034_v25 = vpop.f32.mrb[10].mxu0 }
 0x36c   : > { %v2035_v5 = vpop.f32.mrb[11].mxu0  ;;  %v4749_v25 = vld [vmem:[#allocation16 + $0xe0] ss:$8 sps:$4 sm:$0xff]  }
 0x3a7   : > { %v1989_v9 = vpop.f32.mrb[24].mxu1 }
 0x3a8   : > { %v1990_v10 = vadd.f32 %v1989_v9, %v1709_v62  ;;  %v1991_v12 = vpop.f32.mrb[25].mxu1  ;;  %v4748_v62 = vld [vmem:[#allocation16 + $0xd4] ss:$8 sps:$4 sm:$0xff]   ;;  %v4755_v9 = vld [vmem:[#allocation19] ss:$12 sps:$4 sm:$0xff]  }
 0x3a9   : > { %v1992_v19 = vadd.f32 %v1991_v12, %v1711_v50  ;;  %v1993_v20 = vpop.f32.mrb[26].mxu1  ;;  %v889_v50 = vrot.slane %v5968_v16, %v888_v61  ;;  %v4758_v12 = vld [vmem:[#allocation19 + $0x18] ss:$12 sps:$4 sm:$0xff]   ;;  %v4817_v61 = vld [vmem:[#allocation19 + $0x170] ss:$12 sps:$4 sm:$0xff]  }
 0x3aa   : > { %v2031_v21 = vadd.f32 %v2030_v1, %v1990_v10  ;;  %v1994_v22 = vpop.f32.mrb[27].mxu1  ;;  %v4751_v1 = vld [vmem:[#allocation16 + $0xe4] ss:$8 sps:$4 sm:$0xff]   ;;  %v4761_v20 = vld [vmem:[#allocation19 + $0x30] ss:$12 sps:$4 sm:$0xff]  }
 0x3ab   : > { %v2033_v24 = vadd.f32 %v2032_v3, %v1992_v19  ;;  %v1096_v5 = vadd.f32 %v6012_v52, %v889_v50  ;;  %v4757_v10 = vld [vmem:[#allocation19 + $0x4] ss:$12 sps:$4 sm:$0xff]   ;;  %v4763_v19 = vld [vmem:[#allocation19 + $0x34] ss:$12 sps:$4 sm:$0xff]   ;;  %v4766_v22 = vld [vmem:[#allocation19 + $0x4c] ss:$12 sps:$4 sm:$0xff]  }
 0x3ac   : > { %v2049_v26 = vadd.f32 %v2042_v11, %v2031_v21  ;;  %v4760_v11 = vld [vmem:[#allocation19 + $0x1c] ss:$12 sps:$4 sm:$0xff]   ;;  %3050 = vmatprep.subr.bf16.mxu1 %v4757_v10  ;;  %v4787_v21 = vld [vmem:[#allocation19 + $0xe0] ss:$12 sps:$4 sm:$0xff]   ;;  %v4821_v50 = vld [vmem:[#allocation17 + $0x4] ss:$12 sps:$4 sm:$0xff]  }
 0x3ad   : > { %v2050_v27 = vadd.f32 %v2046_v17, %v2033_v24  ;;  %v1142_v8 = vmax.f32 %v1096_v5, 0.0  ;;  %3051 = vmatpush1.bf16.msra.mxu1 %v4755_v9  ;;  %v4782_v17 = vld [vmem:[#allocation19 + $0xc8] ss:$12 sps:$4 sm:$0xff]   ;;  %v4792_v24 = vld [vmem:[#allocation19 + $0xf8] ss:$12 sps:$4 sm:$0xff]  }
 0x3ae   : > { %v2051_v28 = vmax.f32 %v2049_v26, 0.0  ;;  %3052 = vmatprep.subr.bf16.mxu1 %v4760_v11  ;;  %v4783_v52 = vld [vmem:[#allocation19 + $0x8] ss:$12 sps:$4 sm:$0xff]  }
 0x3af   : > { %v2052_v31 = vmax.f32 %v2050_v27, 0.0  ;;  %v2479_v16 = vpack.c.bf16 %v1142_v8, %v1142_v8  ;;  %v4764_v26 = vld [vmem:[#allocation19 + $0x48] ss:$12 sps:$4 sm:$0xff]   ;;  %v4769_v27 = vld [vmem:[#allocation19 + $0x64] ss:$12 sps:$4 sm:$0xff]  }
 0x3b0   : > { %v2053_v34 = vpack.c.bf16 %v2051_v28, %v2051_v28  ;;  %v4793_v28 = vld [vmem:[#allocation19 + $0x38] ss:$12 sps:$4 sm:$0xff]   ;;  %v2513_v8 = vld [vmem:[%s6280_s30] sm:$0x3] }
 0x3b1   : > { %v2054_v32 = vpack.c.bf16 %v2052_v31, %v2052_v31  ;;  %3053 = vmatpush1.bf16.msra.mxu1 %v4758_v12  ;;  %v4767_v31 = vld [vmem:[#allocation19 + $0x60] ss:$12 sps:$4 sm:$0xff]   ;;  %v2518_v9 = vrot.slane %v2513_v8, %v5963_v15  ;;  %v2522_v10 = vrot.slane %v2513_v8, %v5976_v18  ;;  %v4873_v8 = vld [vmem:[#allocation17 + $0x124] ss:$12 sps:$4 sm:$0xff]  }
 0x3b2   : > { %3054 = vmatprep.subr.bf16.mxu1 %v4763_v19 }
 0x3b3   : > { %2222 = vmatprep.mubr.bf16.mxu0 %v2054_v32  ;;  %v4772_v32 = vld [vmem:[#allocation19 + $0x7c] ss:$12 sps:$4 sm:$0xff]  }
 0x3b4   : > { %2223 = vmatmul.mubr.bf16.vlgmr.msra.gmra.mrb[12].mxu0 %v2053_v34  ;;  %v4802_v34 = vld [vmem:[#allocation19 + $0x128] ss:$12 sps:$4 sm:$0xff]  }
 0x3b5   : > { %2686 = vmatpush1.bf16.msra.mxu0 %v4707_v33  ;;  %2717 = vmatprep.mubr.bf16.mxu0 %v2480_v36  ;;  %v4798_v33 = vld [vmem:[#allocation19 + $0x50] ss:$12 sps:$4 sm:$0xff]   ;;  %v4775_v36 = vld [vmem:[#allocation19 + $0x94] ss:$12 sps:$4 sm:$0xff]  }
 0x3b6   : > { %2687 = vmatprep.subr.bf16.mxu0 %v4712_v35  ;;  %3055 = vmatpush1.bf16.msra.mxu1 %v4761_v20  ;;  %v4770_v35 = vld [vmem:[#allocation19 + $0x78] ss:$12 sps:$4 sm:$0xff]  }
 0x3b7   : > { %3056 = vmatprep.subr.bf16.mxu1 %v4766_v22 }
 0x3b9   : > { %2688 = vmatpush1.bf16.msra.mxu0 %v4710_v37  ;;  %v4803_v37 = vld [vmem:[#allocation19 + $0x68] ss:$12 sps:$4 sm:$0xff]  }
 0x3ba   : > { %2689 = vmatprep.subr.bf16.mxu0 %v4715_v38  ;;  %3057 = vmatpush1.bf16.msra.mxu1 %v4764_v26  ;;  %v4807_v38 = vld [vmem:[#allocation19 + $0x140] ss:$12 sps:$4 sm:$0xff]  }
 0x3bb   : > { %3058 = vmatprep.subr.bf16.mxu1 %v4769_v27  ;;  %v4819_v27 = vld [vmem:[#allocation17] ss:$12 sps:$4 sm:$0xff]  }
 0x3bd   : > { %2690 = vmatpush1.bf16.msra.mxu0 %v4713_v57  ;;  %v4773_v57 = vld [vmem:[#allocation19 + $0x90] ss:$12 sps:$4 sm:$0xff]  }
 0x3be   : > { %2691 = vmatprep.subr.bf16.mxu0 %v4718_v39  ;;  %3059 = vmatpush1.bf16.msra.mxu1 %v4767_v31  ;;  %v4778_v39 = vld [vmem:[#allocation19 + $0xac] ss:$12 sps:$4 sm:$0xff]   ;;  %v4826_v31 = vld [vmem:[#allocation17 + $0x1c] ss:$12 sps:$4 sm:$0xff]  }
 0x3bf   : > { %3060 = vmatprep.subr.bf16.mxu1 %v4772_v32  ;;  %v4827_v32 = vld [vmem:[#allocation17 + $0xe0] ss:$12 sps:$4 sm:$0xff]  }
 0x3c1   : > { %2692 = vmatpush1.bf16.msra.mxu0 %v4716_v40  ;;  %v4808_v40 = vld [vmem:[#allocation19 + $0x80] ss:$12 sps:$4 sm:$0xff]  }
 0x3c2   : > { %2693 = vmatprep.subr.bf16.mxu0 %v4721_v41  ;;  %3061 = vmatpush1.bf16.msra.mxu1 %v4770_v35  ;;  %v4776_v41 = vld [vmem:[#allocation19 + $0xa8] ss:$12 sps:$4 sm:$0xff]  }
 0x3c3   : > { %3062 = vmatprep.subr.bf16.mxu1 %v4775_v36  ;;  %v4831_v35 = vld [vmem:[#allocation17 + $0x34] ss:$12 sps:$4 sm:$0xff]   ;;  %v4832_v36 = vld [vmem:[#allocation17 + $0xf8] ss:$12 sps:$4 sm:$0xff]  }
 0x3c5   : > { %2694 = vmatpush1.bf16.msra.mxu0 %v4719_v42  ;;  %v4781_v42 = vld [vmem:[#allocation19 + $0xc4] ss:$12 sps:$4 sm:$0xff]  }
 0x3c6   : > { %2695 = vmatprep.subr.bf16.mxu0 %v4724_v43  ;;  %3063 = vmatpush1.bf16.msra.mxu1 %v4773_v57  ;;  %v4779_v43 = vld [vmem:[#allocation19 + $0xc0] ss:$12 sps:$4 sm:$0xff]  }
 0x3c7   : > { %3064 = vmatprep.subr.bf16.mxu1 %v4778_v39  ;;  %v4836_v57 = vld [vmem:[#allocation17 + $0x4c] ss:$12 sps:$4 sm:$0xff]   ;;  %v4837_v39 = vld [vmem:[#allocation17 + $0x110] ss:$12 sps:$4 sm:$0xff]  }
 0x3c9   : > { %2696 = vmatpush1.bf16.msra.mxu0 %v4722_v45  ;;  %v4786_v45 = vld [vmem:[#allocation19 + $0xdc] ss:$12 sps:$4 sm:$0xff]  }
 0x3ca   : > { %2697 = vmatprep.subr.bf16.mxu0 %v4727_v46  ;;  %3065 = vmatpush1.bf16.msra.mxu1 %v4776_v41  ;;  %v4784_v46 = vld [vmem:[#allocation19 + $0xd8] ss:$12 sps:$4 sm:$0xff]   ;;  %v4838_v41 = vld [vmem:[#allocation17 + $0x50] ss:$12 sps:$4 sm:$0xff]  }
 0x3cb   : > { %3066 = vmatprep.subr.bf16.mxu1 %v4781_v42  ;;  %v4841_v42 = vld [vmem:[#allocation17 + $0x64] ss:$12 sps:$4 sm:$0xff]  }
 0x3cd   : > { %2698 = vmatpush1.bf16.msra.mxu0 %v4725_v47  ;;  %v4791_v47 = vld [vmem:[#allocation19 + $0xf4] ss:$12 sps:$4 sm:$0xff]  }
 0x3ce   : > { %2699 = vmatprep.subr.bf16.mxu0 %v4730_v48  ;;  %3067 = vmatpush1.bf16.msra.mxu1 %v4779_v43  ;;  %v4789_v48 = vld [vmem:[#allocation19 + $0xf0] ss:$12 sps:$4 sm:$0xff]   ;;  %v4842_v43 = vld [vmem:[#allocation17 + $0x128] ss:$12 sps:$4 sm:$0xff]  }
 0x3cf   : > { %3068 = vmatprep.subr.bf16.mxu1 %v4786_v45  ;;  %v4839_v45 = vld [vmem:[#allocation17 + $0x60] ss:$12 sps:$4 sm:$0xff]  }
 0x3d1   : > { %2700 = vmatpush1.bf16.msra.mxu0 %v4728_v49  ;;  %v4796_v49 = vld [vmem:[#allocation19 + $0x10c] ss:$12 sps:$4 sm:$0xff]  }
 0x3d2   : > { %2701 = vmatprep.subr.bf16.mxu0 %v4733_v51  ;;  %3069 = vmatpush1.bf16.msra.mxu1 %v4784_v46  ;;  %v4794_v51 = vld [vmem:[#allocation19 + $0x108] ss:$12 sps:$4 sm:$0xff]  }
 0x3d3   : > { %3070 = vmatprep.subr.bf16.mxu1 %v4791_v47  ;;  %v4843_v46 = vld [vmem:[#allocation17 + $0x68] ss:$12 sps:$4 sm:$0xff]  }
 0x3d4   : > { %v4846_v47 = vld [vmem:[#allocation17 + $0x7c] ss:$12 sps:$4 sm:$0xff]  }
 0x3d5   : > { %2702 = vmatpush1.bf16.msra.mxu0 %v4731_v0  ;;  %v4801_v0 = vld [vmem:[#allocation19 + $0x124] ss:$12 sps:$4 sm:$0xff]  }
 0x3d6   : > { %2703 = vmatprep.subr.bf16.mxu0 %v4736_v53  ;;  %3071 = vmatpush1.bf16.msra.mxu1 %v4789_v48  ;;  %v4799_v53 = vld [vmem:[#allocation19 + $0x120] ss:$12 sps:$4 sm:$0xff]  }
 0x3d7   : > { %3072 = vmatprep.subr.bf16.mxu1 %v4796_v49  ;;  %v4847_v48 = vld [vmem:[#allocation17 + $0x140] ss:$12 sps:$4 sm:$0xff]   ;;  %v4844_v49 = vld [vmem:[#allocation17 + $0x78] ss:$12 sps:$4 sm:$0xff]  }
 0x3d9   : > { %2704 = vmatpush1.bf16.msra.mxu0 %v4734_v54  ;;  %v4806_v54 = vld [vmem:[#allocation19 + $0x13c] ss:$12 sps:$4 sm:$0xff]  }
 0x3da   : > { %2705 = vmatprep.subr.bf16.mxu0 %v4739_v55  ;;  %3073 = vmatpush1.bf16.msra.mxu1 %v4794_v51  ;;  %v4804_v55 = vld [vmem:[#allocation19 + $0x138] ss:$12 sps:$4 sm:$0xff]   ;;  %v4848_v51 = vld [vmem:[#allocation17 + $0x80] ss:$12 sps:$4 sm:$0xff]  }
 0x3db   : > { %3074 = vmatprep.subr.bf16.mxu1 %v4801_v0 }
 0x3dd   : > { %2706 = vmatpush1.bf16.msra.mxu0 %v4737_v44  ;;  %v4811_v44 = vld [vmem:[#allocation19 + $0x154] ss:$12 sps:$4 sm:$0xff]  }
 0x3de   : > { %2707 = vmatprep.subr.bf16.mxu0 %v4742_v56  ;;  %3075 = vmatpush1.bf16.msra.mxu1 %v4799_v53  ;;  %v4812_v56 = vld [vmem:[#allocation19 + $0x158] ss:$12 sps:$4 sm:$0xff]   ;;  %v4851_v53 = vld [vmem:[#allocation17 + $0x94] ss:$12 sps:$4 sm:$0xff]  }
 0x3df   : > { %3076 = vmatprep.subr.bf16.mxu1 %v4806_v54  ;;  %v4852_v54 = vld [vmem:[#allocation17 + $0x158] ss:$12 sps:$4 sm:$0xff]  }
 0x3e1   : > { %2708 = vmatpush1.bf16.msra.mxu0 %v4740_v58  ;;  %v4809_v58 = vld [vmem:[#allocation19 + $0x150] ss:$12 sps:$4 sm:$0xff]  }
 0x3e2   : > { %2709 = vmatprep.subr.bf16.mxu0 %v4745_v59  ;;  %3077 = vmatpush1.bf16.msra.mxu1 %v4804_v55  ;;  %v4813_v59 = vld [vmem:[#allocation19 + $0x98] ss:$12 sps:$4 sm:$0xff]   ;;  %v4849_v55 = vld [vmem:[#allocation17 + $0x90] ss:$12 sps:$4 sm:$0xff]  }
 0x3e3   : > { %3078 = vmatprep.subr.bf16.mxu1 %v4811_v44  ;;  %v4853_v44 = vld [vmem:[#allocation17 + $0x98] ss:$12 sps:$4 sm:$0xff]  }
 0x3e5   : > { %2710 = vmatpush1.bf16.msra.mxu0 %v4743_v60  ;;  %v4816_v60 = vld [vmem:[#allocation19 + $0x16c] ss:$12 sps:$4 sm:$0xff]  }
 0x3e6   : > { %2711 = vmatprep.subr.bf16.mxu0 %v4748_v62  ;;  %3079 = vmatpush1.bf16.msra.mxu1 %v4809_v58  ;;  %v4814_v62 = vld [vmem:[#allocation19 + $0x168] ss:$12 sps:$4 sm:$0xff]   ;;  %v4856_v58 = vld [vmem:[#allocation17 + $0xac] ss:$12 sps:$4 sm:$0xff]  }
 0x3e7   : > { %v6039_v2 = vpop.f32.mrb[28].mxu1  ;;  %3080 = vmatprep.subr.bf16.mxu1 %v4816_v60  ;;  %v4854_v60 = vld [vmem:[#allocation17 + $0xa8] ss:$12 sps:$4 sm:$0xff]  }
 0x3e8   : > { %v6041_v3 = vpop.f32.mrb[29].mxu1 }
 0x3e9   : > { %2712 = vmatpush1.bf16.msra.mxu0 %v4746_v63  ;;  %v2474_v4 = vpop.f32.mrb[30].mxu1  ;;  %v4818_v63 = vld [vmem:[#allocation19 + $0xb0] ss:$12 sps:$4 sm:$0xff]  }
 0x3ea   : > { %v2475_v6 = vpop.f32.mrb[31].mxu1  ;;  %2713 = vmatprep.subr.bf16.mxu0 %v4751_v1  ;;  %3081 = vmatpush1.bf16.msra.mxu1 %v4814_v62  ;;  %v4822_v1 = vld [vmem:[#allocation17 + $0xc8] ss:$12 sps:$4 sm:$0xff]  }
 0x3eb   : > { %4257 = vmatprep.subr.bf16.mxu1 %v4822_v1 }
 0x3ed   : > { %2714 = vmatpush1.bf16.msra.mxu0 %v4749_v25 }
 0x3ee   : > { %2715 = vmatprep.subr.bf16.mxu0 %v4754_v14 }
 0x3f1   : > { %2716 = vmatpush1.bf16.msra.mxu0 %v4752_v7  ;;  %v6049_v7 = vld [vmem:[%s6279_s28] sm:$0x3]  ;;  %s5227_s28 = sshll.u32 %s5402_s2, 4  ;;  %s5228_s28 = int_to_ptr.vmem [resolvable:$false] %s5227_s28 }
 0x3f2   : > { %4235 = vmatprep.subr.bf16.mxu0 %v4782_v17  ;;  %v2269_v0 = vrot.slane %v6049_v7, %v5963_v15  ;;  %s5229_s0 = scalar_lea.vmem %s5228_s28, 768  ;;  %p5230_p5 = scmp.lt.s32.totalorder %s3610_s6, %s5228_s28 }
 0x3f3   : > { %p5231_p10 = scmp.lt.s32.totalorder %s5229_s0, %s5223_s21 }
 0x3f4   : > { %2718 = vmatmul.mubr.bf16.vlgmr.msra.gmra.mrb[16].mxu0 %v2479_v16  ;;  %v2273_v16 = vrot.slane %v6049_v7, %v5976_v18  ;;  %v4868_v7 = vld [vmem:[#allocation17 + $0x108] ss:$12 sps:$4 sm:$0xff]  }
 0x3f5   : > { %4236 = vmatpush3.bf16.msra.mxu0 %v4783_v52  ;;  %p5232_p1 = por %p5231_p10, %p5230_p5 }
 0x3f6   : > { %4237 = vmatprep.subr.bf16.mxu0 %v4787_v21  ;;  %v2473_v12 = vadd.f32 %v6041_v3, %v2273_v16  ;;  %v4824_v3 = vld [vmem:[#allocation17 + $0x18] ss:$12 sps:$4 sm:$0xff]   ;;  %v4871_v16 = vld [vmem:[#allocation17 + $0x120] ss:$12 sps:$4 sm:$0xff]  }
 0x3f7   : > { %p5233_p11 = pnand %p5232_p1, %p5226_p8 }
 0x3f9   : > { %4238 = vmatpush3.bf16.msra.mxu0 %v4788_v23 }
 0x3fa   : > { %4239 = vmatprep.subr.bf16.mxu0 %v4792_v24  ;;  %v2478_v24 = vmax.f32 %v2473_v12, 0.0  ;;  %v4877_v12 = vld [vmem:[#allocation17 + $0x150] ss:$12 sps:$4 sm:$0xff]  }
 0x3fd   : > { %4240 = vmatpush3.bf16.msra.mxu0 %v4793_v28  ;;  %v4823_v28 = vld [vmem:[#allocation17 + $0x8] ss:$12 sps:$4 sm:$0xff]  }
 0x3fe   : > { %4241 = vmatprep.subr.bf16.mxu0 %v4797_v30 }
 0x401   : > { %4242 = vmatpush3.bf16.msra.mxu0 %v4798_v33  ;;  %v3132_v33 = vpack.c.bf16 %v2478_v24, %v2478_v24 }
 0x402   : > { %4243 = vmatprep.subr.bf16.mxu0 %v4802_v34  ;;  %v4828_v34 = vld [vmem:[#allocation17 + $0x20] ss:$12 sps:$4 sm:$0xff]  }
 0x405   : > { %4244 = vmatpush3.bf16.msra.mxu0 %v4803_v37  ;;  %v4829_v37 = vld [vmem:[#allocation17 + $0x30] ss:$12 sps:$4 sm:$0xff]  }
 0x406   : > { %4245 = vmatprep.subr.bf16.mxu0 %v4807_v38  ;;  %v4833_v38 = vld [vmem:[#allocation17 + $0x38] ss:$12 sps:$4 sm:$0xff]  }
 0x409   : > { %4246 = vmatpush3.bf16.msra.mxu0 %v4808_v40  ;;  %v4834_v40 = vld [vmem:[#allocation17 + $0x48] ss:$12 sps:$4 sm:$0xff]  }
 0x40a   : > { %4247 = vmatprep.subr.bf16.mxu0 %v4812_v56  ;;  %v2471_v56 = vadd.f32 %v6039_v2, %v2269_v0  ;;  %v4862_v2 = vld [vmem:[#allocation17 + $0xd8] ss:$12 sps:$4 sm:$0xff]  }
 0x40c   : > { %v2477_v62 = vmax.f32 %v2471_v56, 0.0 }
 0x40d   : > { %4248 = vmatpush3.bf16.msra.mxu0 %v4813_v59  ;;  %v4857_v59 = vld [vmem:[#allocation17 + $0x170] ss:$12 sps:$4 sm:$0xff]  }
 0x40e   : > { %4249 = vmatprep.subr.bf16.mxu0 %v4817_v61  ;;  %v4858_v61 = vld [vmem:[#allocation17 + $0xb0] ss:$12 sps:$4 sm:$0xff]   ;;  %v3131_v1 = vpack.c.bf16 %v2477_v62, %v2477_v62 }
 0x411   : > { %4250 = vmatpush3.bf16.msra.mxu0 %v4818_v63  ;;  %v4861_v63 = vld [vmem:[#allocation17 + $0xc4] ss:$12 sps:$4 sm:$0xff]  }
 0x412   : > { %3453 = vmatprep.subr.bf16.mxu0 %v4821_v50  ;;  %v4859_v50 = vld [vmem:[#allocation17 + $0xc0] ss:$12 sps:$4 sm:$0xff]  }
 0x487   : > { %v4229_v4 = vpop.f32.mrb[12].mxu0 }
 0x488   : > { %v4230_v25 = vpop.f32.mrb[13].mxu0 }
 0x489   : > { %v6044_v5 = vadd.f32 %v4230_v25, %v4229_v4  ;;  %v4232_v6 = vpop.f32.mrb[14].mxu0  ;;  %v4864_v4 = vld [vmem:[#allocation17 + $0xdc] ss:$12 sps:$4 sm:$0xff]   ;;  %v4867_v25 = vld [vmem:[#allocation17 + $0xf4] ss:$12 sps:$4 sm:$0xff]  }
 0x48a   : > { %v4233_v14 = vpop.f32.mrb[15].mxu0  ;;  %v4865_v6 = vld [vmem:[#allocation17 + $0xf0] ss:$12 sps:$4 sm:$0xff]  }
 0x48b   : > { %v4870_v14 = vld [vmem:[#allocation17 + $0x10c] ss:$12 sps:$4 sm:$0xff]  }
 0x4c7   : > { %v2719_v11 = vpop.f32.mrb[16].mxu0 }
 0x4c8   : > { %v2720_v19 = vadd.f32 %v2719_v11, %v2518_v9  ;;  %v2721_v17 = vpop.f32.mrb[17].mxu0  ;;  %v4876_v9 = vld [vmem:[#allocation17 + $0x13c] ss:$12 sps:$4 sm:$0xff]   ;;  %v4879_v11 = vld [vmem:[#allocation17 + $0x154] ss:$12 sps:$4 sm:$0xff]  }
 0x4c9   : > { %v2722_v52 = vadd.f32 %v2721_v17, %v2522_v10  ;;  %v2723_v20 = vpop.f32.mrb[18].mxu0  ;;  %v4874_v10 = vld [vmem:[#allocation17 + $0x138] ss:$12 sps:$4 sm:$0xff]   ;;  %v4880_v17 = vld [vmem:[#allocation17 + $0x168] ss:$12 sps:$4 sm:$0xff]  }
 0x4ca   : > { %v2726_v21 = vmax.f32 %v2720_v19, 0.0  ;;  %v2724_v22 = vpop.f32.mrb[19].mxu0  ;;  %v4882_v19 = vld [vmem:[#allocation17 + $0x16c] ss:$12 sps:$4 sm:$0xff]  }
 0x4cb   : > { %v2727_v23 = vmax.f32 %v2722_v52, 0.0 }
 0x4cc   : > { %v2728_v30 = vpack.c.bf16 %v2726_v21, %v2726_v21 }
 0x4cd   : > { %v2729_v26 = vpack.c.bf16 %v2727_v23, %v2727_v23 }
 0x4cf   : > { %3082 = vmatprep.mubr.bf16.mxu1 %v2729_v26  ;;  %3123 = vmatprep.mubr.bf16.mxu0 %v2729_v26 }
 0x4d0   : > { %3083 = vmatmul.mubr.bf16.vlgmr.msra.gmra.mrb[32].mxu1 %v2728_v30  ;;  %3124 = vmatmul.mubr.bf16.vlgmr.msra.gmra.mrb[20].mxu0 %v2728_v30 }
 0x4d1   : > { %3454 = vmatpush1.bf16.msra.mxu0 %v4819_v27  ;;  %4258 = vmatpush3.bf16.msra.mxu1 %v4823_v28 }
 0x4d2   : > { %3485 = vmatprep.mubr.bf16.mxu0 %v3132_v33  ;;  %3526 = vmatprep.mubr.bf16.mxu1 %v3132_v33 }
 0x4d3   : > { %3455 = vmatprep.subr.bf16.mxu0 %v4826_v31  ;;  %4259 = vmatprep.subr.bf16.mxu1 %v4827_v32 }
 0x4d5   : > { %3456 = vmatpush1.bf16.msra.mxu0 %v4824_v3  ;;  %4260 = vmatpush3.bf16.msra.mxu1 %v4828_v34 }
 0x4d6   : > { %3457 = vmatprep.subr.bf16.mxu0 %v4831_v35  ;;  %4261 = vmatprep.subr.bf16.mxu1 %v4832_v36  ;;  %v3537_v35 = vld [vmem:[#allocation20] sm:$0x7] }
 0x4d7   : > { %v3542_v36 = vrot.slane %v3537_v35, %v5963_v15 }
 0x4d9   : > { %3458 = vmatpush1.bf16.msra.mxu0 %v4829_v37  ;;  %4262 = vmatpush3.bf16.msra.mxu1 %v4833_v38  ;;  %v3546_v38 = vrot.slane %v3537_v35, %v5976_v18 }
 0x4da   : > { %3459 = vmatprep.subr.bf16.mxu0 %v4836_v57  ;;  %4263 = vmatprep.subr.bf16.mxu1 %v4837_v39  ;;  %v3550_v57 = vrot.slane %v3537_v35, %v5990_v29 }
 0x4dd   : > { %3460 = vmatpush1.bf16.msra.mxu0 %v4834_v40  ;;  %4264 = vmatpush3.bf16.msra.mxu1 %v4838_v41 }
 0x4de   : > { %3461 = vmatprep.subr.bf16.mxu0 %v4841_v42  ;;  %4265 = vmatprep.subr.bf16.mxu1 %v4842_v43 }
 0x4e1   : > { %3462 = vmatpush1.bf16.msra.mxu0 %v4839_v45  ;;  %4266 = vmatpush3.bf16.msra.mxu1 %v4843_v46 }
 0x4e2   : > { %3463 = vmatprep.subr.bf16.mxu0 %v4846_v47  ;;  %4267 = vmatprep.subr.bf16.mxu1 %v4847_v48 }
 0x4e5   : > { %3464 = vmatpush1.bf16.msra.mxu0 %v4844_v49  ;;  %4268 = vmatpush3.bf16.msra.mxu1 %v4848_v51 }
 0x4e6   : > { %3465 = vmatprep.subr.bf16.mxu0 %v4851_v53  ;;  %4269 = vmatprep.subr.bf16.mxu1 %v4852_v54 }
 0x4e9   : > { %3466 = vmatpush1.bf16.msra.mxu0 %v4849_v55  ;;  %4270 = vmatpush3.bf16.msra.mxu1 %v4853_v44 }
 0x4ea   : > { %3467 = vmatprep.subr.bf16.mxu0 %v4856_v58  ;;  %4271 = vmatprep.subr.bf16.mxu1 %v4857_v59 }
 0x4ed   : > { %3468 = vmatpush1.bf16.msra.mxu0 %v4854_v60  ;;  %4272 = vmatpush3.bf16.msra.mxu1 %v4858_v61 }
 0x4ee   : > { %3469 = vmatprep.subr.bf16.mxu0 %v4861_v63 }
 0x4f0   : > { %3527 = vmatmul.mubr.bf16.vlgmr.msra.gmra.mrb[36].mxu1 %v3131_v1 }
 0x4f1   : > { %3470 = vmatpush1.bf16.msra.mxu0 %v4859_v50 }
 0x4f2   : > { %3471 = vmatprep.subr.bf16.mxu0 %v4864_v4 }
 0x4f5   : > { %3472 = vmatpush1.bf16.msra.mxu0 %v4862_v2 }
 0x4f6   : > { %3473 = vmatprep.subr.bf16.mxu0 %v4867_v25 }
 0x4f9   : > { %3474 = vmatpush1.bf16.msra.mxu0 %v4865_v6 }
 0x4fa   : > { %3475 = vmatprep.subr.bf16.mxu0 %v4870_v14 }
 0x4fd   : > { %3476 = vmatpush1.bf16.msra.mxu0 %v4868_v7 }
 0x4fe   : > { %3477 = vmatprep.subr.bf16.mxu0 %v4873_v8 }
 0x501   : > { %3478 = vmatpush1.bf16.msra.mxu0 %v4871_v16 }
 0x502   : > { %3479 = vmatprep.subr.bf16.mxu0 %v4876_v9 }
 0x505   : > { %3480 = vmatpush1.bf16.msra.mxu0 %v4874_v10 }
 0x506   : > { %3481 = vmatprep.subr.bf16.mxu0 %v4879_v11 }
 0x509   : > { %3482 = vmatpush1.bf16.msra.mxu0 %v4877_v12 }
 0x50a   : > { %3483 = vmatprep.subr.bf16.mxu0 %v4882_v19 }
 0x50d   : > { %3484 = vmatpush1.bf16.msra.mxu0 %v4880_v17 }
 0x510   : > { %3486 = vmatmul.mubr.bf16.vlgmr.msra.gmra.mrb[24].mxu0 %v3131_v1 }
 0x5a3   : > { %v3084_v52 = vpop.f32.mrb[32].mxu1  ;;  %v4251_v20 = vpop.f32.mrb[20].mxu0 }
 0x5a4   : > { %v3086_v21 = vpop.f32.mrb[33].mxu1  ;;  %v4252_v22 = vpop.f32.mrb[21].mxu0 }
 0x5a5   : > { %v4253_v23 = vadd.f32 %v4252_v22, %v4251_v20  ;;  %v3088_v24 = vpop.f32.mrb[34].mxu1  ;;  %v4254_v26 = vpop.f32.mrb[22].mxu0 }
 0x5a6   : > { %v3089_v27 = vpop.f32.mrb[35].mxu1  ;;  %v4255_v28 = vpop.f32.mrb[23].mxu0 }
 0x5c3   : > { %v4273_v30 = vpop.f32.mrb[36].mxu1 }
 0x5c4   : > { %v4274_v31 = vpop.f32.mrb[37].mxu1 }
 0x5c5   : > { %v4275_v32 = vadd.f32 %v4274_v31, %v4273_v30  ;;  %v4276_v33 = vpop.f32.mrb[38].mxu1 }
 0x5c6   : > { %v4277_v3 = vpop.f32.mrb[39].mxu1 }
 0x5c7   : > { %v3536_v34 = vsub.f32 %v4253_v23, %v4275_v32 }
 0x5c9   : > { %v3556_v47 = vadd.f32 %v3550_v57, %v3536_v34 }
 0x5cb   : > { %v3559_v49 = vmul.f32 %v3556_v47, %v3556_v47 }
 0x5e3   : > { %v3487_v37 = vpop.f32.mrb[24].mxu0 }
 0x5e4   : > { %v3534_v39 = vsub.f32 %v3084_v52, %v3487_v37  ;;  %v3489_v40 = vpop.f32.mrb[25].mxu0 }
 0x5e5   : > { %v3535_v41 = vsub.f32 %v3086_v21, %v3489_v40  ;;  %v3491_v42 = vpop.f32.mrb[26].mxu0 }
 0x5e6   : > { %v3554_v43 = vadd.f32 %v3542_v36, %v3534_v39  ;;  %v3492_v45 = vpop.f32.mrb[27].mxu0 }
 0x5e7   : > { %v3555_v46 = vadd.f32 %v3546_v38, %v3535_v41 }
 0x5e8   : > { %v3557_v48 = vmul.f32 %v3554_v43, %v3554_v43 }
 0x5e9   : > { %v3558_v15 = vmul.f32 %v3555_v46, %v3555_v46 }
 0x5eb   : > { %v3560_v51 = vadd.f32 %v3558_v15, %v3557_v48 }
 0x5ed   : > { %v3561_v18 = vadd.f32 %v3560_v51, %v3559_v49 }
 0x5ef   : > { %3562 = vadd.xlane.f32.xlu0 %v3561_v18 }
 0x5f0   : > { %5236 = shalt.err (!%p5233_p11)
}
 0x5f1   : > { %s5237_s26 = scalar_lea.hbm %s6072_s15, 384  ;;  %s5241_s30 = scalar_lea.hbm %s6281_s5, 768 }
 0x5f2   : > { %p5238_p12 = scmp.ne.s32.totalorder %s6072_s15, %s5237_s26  ;;  %p5242_p9 = scmp.lt.u32.totalorder %s6072_s15, %s6281_s5 }
 0x5f3   : > { %p5243_p0 = scmp.lt.u32.totalorder %s5241_s30, %s5237_s26  ;;  %p5245_p3 = scmp.lt.u32.totalorder %s5237_s26, %s6072_s15 }
 0x5f4   : > { %p5239_p13 = pnand %p5238_p12, %p6282_p6 }
 0x5f5   : > { %p5244_p2 = por %p5243_p0, %p5242_p9 }
 0x5f6   : > { %p5240_p7 = pneg %p5239_p13 }
 0x5f7   : > { %p5246_p4 = por %p5245_p3, %p5244_p2 }
 0x5f9   : > { %p5247_p8 = pnand %p5246_p4, %p5240_p7 }
 0x5fb   : > { %5250 = shalt.err (!%p5247_p8)
}
 0x5fc   : > { %4343 = dma.vmem_to_hbm [thread:$0]  (%p6282_p6), %s3610_s6, 384, %s6072_s15, %s6076_s12  }
 0x5fd   : > { %s6283_s28 = sld [smem:[#allocation52_spill]]  ;;  %s3595_s20 = sshll.u32 %s5994_s14, 4  ;;  %s3596_s20 = int_to_ptr.vmem [resolvable:$true] %s3595_s20 }
 0x5fe   : > { %s3571_s26 = scalar_lea.sflag [#allocation4], %s5895_s19  ;;  %s5251_s10 = scalar_lea.vmem %s3596_s20, 384 }
 0x5ff   : > { %p5252_p5 = scmp.ne.s32.totalorder %s3596_s20, %s5251_s10  ;;  %s5403_s30 = smov [#allocation22]  }
 0x600   : > { %s5255_s7 = sshll.u32 %s5403_s30, 4  ;;  %s5256_s7 = int_to_ptr.vmem [resolvable:$false] %s5255_s7 }
 0x601   : > { %p5253_p10 = pnand %p5252_p5, %p6282_p6  ;;  %s5257_s13 = scalar_lea.vmem %s5256_s7, 768 }
 0x602   : > { %p5258_p11 = scmp.lt.s32.totalorder %s3596_s20, %s5256_s7  ;;  %p5259_p12 = scmp.lt.s32.totalorder %s5257_s13, %s5251_s10 }
 0x603   : > { %s6101_s0 = scalar_lea.hbm %s6283_s28, %s4296_s18  ;;  %p5254_p1 = pneg %p5253_p10 }
 0x604   : > { %p5260_p13 = por %p5259_p12, %p5258_p11 }
 0x606   : > { %p5261_p7 = pnand %p5260_p13, %p5254_p1 }
 0x608   : > { %5264 = shalt.err (!%p5261_p7)
}
 0x609   : > { %s5265_s19 = scalar_lea.hbm %s6101_s0, 384  ;;  %s5269_s6 = scalar_lea.hbm %s6283_s28, 768 }
 0x60a   : > { %p5266_p9 = scmp.ne.s32.totalorder %s6101_s0, %s5265_s19  ;;  %p5270_p3 = scmp.lt.u32.totalorder %s6101_s0, %s6283_s28 }
 0x60b   : > { %p5271_p4 = scmp.lt.u32.totalorder %s5269_s6, %s5265_s19  ;;  %p5273_p5 = scmp.lt.u32.totalorder %s5265_s19, %s6101_s0 }
 0x60c   : > { %p5267_p0 = pnand %p5266_p9, %p6282_p6 }
 0x60d   : > { %p5272_p8 = por %p5271_p4, %p5270_p3 }
 0x60e   : > { %p5268_p2 = pneg %p5267_p0 }
 0x60f   : > { %p5274_p10 = por %p5273_p5, %p5272_p8 }
 0x611   : > { %p5275_p1 = pnand %p5274_p10, %p5268_p2 }
 0x613   : > { %5278 = shalt.err (!%p5275_p1)
}
 0x614   : > { %4342 = dma.vmem_to_hbm [thread:$0]  (%p6282_p6), %s3596_s20, 384, %s6101_s0, %s3571_s26   ;;  %v3566_v29 = vand.u32 127, %v866_v13 }
 0x615   : > { %s6284_s30 = sld [smem:[#allocation46_spill]]  ;;  %s4204_s7 = sshll.u32 %s5531_s3, 7 }
 0x616   : > { %s842_s13 = scalar_lea.vmem [#allocation25], %s5898_s9  ;;  %vm3567_vm2 = vcmp.eq.s32.totalorder %v3566_v29, 127  ;;  %s6285_s6 = sld [smem:[#allocation54_spill]] }
 0x617   : > { %s3622_s14 = sshll.u32 %s842_s13, 4  ;;  %s5404_s9 = smov [#allocation25]   ;;  %s6134_s14 = int_to_ptr.vmem [resolvable:$true] %s3622_s14 }
 0x618   : > { %s5279_s3 = scalar_lea.vmem %s6134_s14, 128  ;;  %s5283_s0 = sshll.u32 %s5404_s9, 4  ;;  %s5284_s0 = int_to_ptr.vmem [resolvable:$false] %s5283_s0 }
 0x619   : > { %p5280_p11 = scmp.ne.s32.totalorder %s6134_s14, %s5279_s3  ;;  %s5285_s20 = scalar_lea.vmem %s5284_s0, 256 }
 0x61a   : > { %p5286_p7 = scmp.lt.s32.totalorder %s6134_s14, %s5284_s0  ;;  %p5287_p9 = scmp.lt.s32.totalorder %s5285_s20, %s5279_s3 }
 0x61b   : > { %v4024_v0 = vld [vmem:[%s6284_s30] ss:$0 sm:$0xff]  ;;  %p5281_p12 = pnand %p5280_p11, %p6282_p6 }
 0x61c   : > { %v2225_v54 = vadd.f32 %v6044_v5, %v4024_v0  ;;  %s6132_s15 = scalar_lea.hbm %s6285_s6, %s4204_s7  ;;  %p5288_p0 = por %p5287_p9, %p5286_p7 }
 0x61d   : > { %p5282_p13 = pneg %p5281_p12 }
 0x61f   : > { %p5289_p2 = pnand %p5288_p0, %p5282_p13 }
 0x67c   : > { %v3563_v53 = vpop.xlane.xlu0 %3562 }
 0x67d   : > { %v3564_v55 = vmul.f32 0.0034722222, %v3563_v53 }
 0x67f   : > { %v3568_v13 = vsel %vm3567_vm2, %v3564_v55, %v2225_v54 }
 0x680   : > { %3569 = vst [vmem:[%s842_s13] sm:$0xff] %v3568_v13 }
 0x681   : > { %5292 = shalt.err (!%p5289_p2)
}
 0x682   : > { %s5293_s26 = scalar_lea.hbm %s6132_s15, 128  ;;  %s5297_s10 = scalar_lea.hbm %s6285_s6, 256 }
 0x683   : > { %p5294_p3 = scmp.ne.s32.totalorder %s6132_s15, %s5293_s26  ;;  %p5298_p5 = scmp.lt.u32.totalorder %s6132_s15, %s6285_s6 }
 0x684   : > { %p5299_p10 = scmp.lt.u32.totalorder %s5297_s10, %s5293_s26  ;;  %p5301_p11 = scmp.lt.u32.totalorder %s5293_s26, %s6132_s15 }
 0x685   : > { %p5295_p4 = pnand %p5294_p3, %p6282_p6 }
 0x686   : > { %p5300_p1 = por %p5299_p10, %p5298_p5 }
 0x687   : > { %p5296_p8 = pneg %p5295_p4 }
 0x688   : > { %p5302_p12 = por %p5301_p11, %p5300_p1 }
 0x68a   : > { %p5303_p13 = pnand %p5302_p12, %p5296_p8 }
 0x68c   : > { %5306 = shalt.err (!%p5303_p13)
}
 0x68d   : > { %4344 = dma.vmem_to_hbm [thread:$0]  (%p6282_p6), %s6134_s14, 128, %s6132_s15, %s6076_s12  }
 0x68e PF: > { %s3634_s13 = sand.u32 1, %s5365_s1   ;;  %p6286_p7 = scmp.ne.s32.totalorder %s6258_s25, 0 }
 0x68f   : > { %p6287_p9 = scmp.ge.s32.totalorder %s5377_s24, 2  ;;  %s3635_s19 = scalar_lea.sflag [#allocation4], %s3634_s13 }
 0x691   : > { %p4387_p0 = pnand %p6287_p9, %p6286_p7 }
 0x693   : > { %5356 = dma.done.wait (!%p4387_p0), %s3635_s19, 384  }
 0x694   : > { %5358 = vsyncadd (!%p4387_p0), %s3635_s19, 4294966912  ;;  %s6288_s18 = sadd.s32 4294967294, %s5377_s24  }
 0x695   : > { %s3643_s3 = sand.u32 1, %s6288_s18  }
 0x696   : > { %s3644_s9 = scalar_lea.sflag [#allocation24], %s3643_s3 }
 0x697   : > { %5360 = dma.done.wait (!%p4387_p0), %s3644_s9, 512  }
 0x698   : > { %5362 = vsyncadd (!%p4387_p0), %s3644_s9, 4294966784  ;;  %p45_p6 = scmp.ge.s32.totalorder %s5786_s4, 4   ;;  %s6289_s1 = smov %s5369_s22 }
 0x699   : > { %s6290_s22 = smov %s5373_s23  ;;  %s6291_s23 = smov %s5797_s8 }
 0x69a   : > { %s6292_s24 = smov %s5786_s4  ;;  %47 = sbr.rel (!%p45_p6) target bundleno = 34 (0x22), region = 222 }
 0x6a1   :  { %3658 = vsyncpa [#allocation3], 1 }
 0x6a2   :  { %3660 = vsyncpa [#allocation3 + $0x1], 1 }
 0x6a3   :  { %3661 = vsyncpa [#allocation6], 1 }
 0x6a4   :  { %3663 = vsyncpa [#allocation6 + $0x1], 1 }
 0x6a5   :  { %3664 = vsyncpa [#allocation9], 1 }
 0x6a6   :  { %3665 = vsyncpa [#allocation12], 1 }
 0x6a7   :  { %3666 = vsyncpa [#allocation15], 1 }
 0x6a8   :  { %3667 = vsyncpa [#allocation18], 1 }
 0x6a9   :  { %3668 = vsyncpa [#allocation21], 1 }
 0x6aa   :  { %3669 = vsyncpa [#allocation4], 1 }
 0x6ab   :  { %3671 = vsyncpa [#allocation4 + $0x1], 1 }
 0x6ac   :  { %3672 = vsyncpa [#allocation24], 1 }
 0x6ad   :  { %3674 = vsyncpa [#allocation24 + $0x1], 1 }

</bundles_post_ra>
